<compile_context>
chip_gen: v7x
topology: tpu7x:2x2x1
jax: 0.10.0
libtpu: 0.0.40
codegen_flags: <defaults>
</compile_context>

<pallas_src>
import functools

import jax
import jax.numpy as jnp
from jax.experimental import pallas as pl
from jax.experimental.pallas import tpu as pltpu

LEAKYRELU_SLOPE = 0.2   # module-level constant in the source repo
BN_EPS = 1e-5


def _round_up(x, m):
    return (x + m - 1) // m * m


# --------------------------------------------------------------------------
# Pass 1 (resident-weight variant): conv-as-matmul + per-tile channel stats.
# Grid = (m_tiles,); weight block is grid-constant -> DMA'd once, VMEM-resident.
# --------------------------------------------------------------------------
def _conv_stats_resident_kernel(p_ref, w_ref, conv_ref, stats_ref):
    # p_ref    : [TM, Kp]  bf16 im2col patch tile
    # w_ref    : [Kp, Cp]  bf16 full (padded) weight, resident
    # conv_ref : [TM, Cp]  bf16 conv output tile
    # stats_ref: [2, Cp]   f32 (row 0 = sum, row 1 = sum of squares), f32 acc
    acc = jnp.dot(p_ref[...], w_ref[...], preferred_element_type=jnp.float32)
    conv_ref[...] = acc.astype(conv_ref.dtype)
    stats_ref[0:1, :] = jnp.sum(acc, axis=0, keepdims=True)
    stats_ref[1:2, :] = jnp.sum(acc * acc, axis=0, keepdims=True)


# --------------------------------------------------------------------------
# Pass 1 (k-tiled fallback): used only when the padded weight does not fit the
# VMEM budget.  Grid = (m_tiles, k_tiles); k is the reduction axis.  The conv
# intermediate is bf16, so accumulation goes through an f32 VMEM scratch.
# --------------------------------------------------------------------------
def _conv_stats_ktiled_kernel(p_ref, w_ref, conv_ref, stats_ref, acc_ref):
    k = pl.program_id(1)

    @pl.when(k == 0)
    def _():
        acc_ref[...] = jnp.zeros_like(acc_ref)

    acc_ref[...] += jnp.dot(p_ref[...], w_ref[...],
                            preferred_element_type=jnp.float32)

    @pl.when(k == pl.num_programs(1) - 1)
    def _():
        acc = acc_ref[...]
        conv_ref[...] = acc.astype(conv_ref.dtype)
        stats_ref[0:1, :] = jnp.sum(acc, axis=0, keepdims=True)
        stats_ref[1:2, :] = jnp.sum(acc * acc, axis=0, keepdims=True)


# --------------------------------------------------------------------------
# Pass 2: folded BatchNorm (per-channel FMA) + LeakyReLU.  bf16 in / bf16 out,
# output aliases the conv intermediate.  Grid = (m2_tiles,), fully parallel.
# --------------------------------------------------------------------------
def _bn_lrelu_kernel(conv_ref, ss_ref, o_ref):
    # ss_ref: [2, Cp] f32 -- row 0 = scale, row 1 = shift
    y = conv_ref[...].astype(jnp.float32) * ss_ref[0:1, :] + ss_ref[1:2, :]
    o_ref[...] = jnp.where(y >= 0, y, LEAKYRELU_SLOPE * y).astype(o_ref.dtype)


# --------------------------------------------------------------------------
# Generation-aware VMEM budget and tile selection.
# --------------------------------------------------------------------------
def _vmem_budget():
    try:
        cap = pltpu.get_tpu_info().vmem_capacity_bytes
    except Exception:
        cap = 64 * 1024 * 1024            # v7x per-TensorCore (most restrictive)
    budget = min(int(cap * 0.6), 72 * 1024 * 1024)   # tiles + double buffers
    limit = max(32 * 1024 * 1024, min(int(cap * 0.85), 100 * 1024 * 1024))
    return budget, limit


def _choose_pass1_tiles(Kp, Cp, budget):
    """Returns (resident, TM_cap, TK)."""
    def resident_bytes(tm):
        return (4 * tm * Kp          # patch tile, bf16, double buffered
                + 4 * Kp * Cp        # weight, bf16 (buffer pair)
                + 4 * tm * Cp        # conv out tile, bf16, double buffered
                + 12 * tm * Cp       # f32 dot result + square temporaries
                + (1 << 16))

    def ktiled_bytes(tm, tk):
        return (4 * tm * tk          # patch tile
                + 4 * tk * Cp        # weight tile
                + 4 * tm * Cp        # conv out tile
                + 4 * tm * Cp        # f32 accumulator scratch
                + 8 * tm * Cp        # temporaries
                + (1 << 16))

    # Prefer the K-resident layout (weight DMA'd once, no reduction axis).
    for tm in (2048, 1024, 512, 256, 128):
        if resident_bytes(tm) <= budget:
            return True, tm, Kp
    for tm in (1024, 512, 256, 128):
        for tk in (2048, 1024, 512, 256, 128):
            if tk <= Kp and Kp % tk == 0 and ktiled_bytes(tm, tk) <= budget:
                return False, tm, tk
    return False, 128, 128


# --------------------------------------------------------------------------
# Wrapper
# --------------------------------------------------------------------------
@functools.partial(jax.jit, static_argnames=("stride", "padding"))
def cnn_unit_pallas(x_nchw, weight, bias, gamma, beta, *, stride=1, padding=1):
    """Forward pass of CNNUnit.

    x_nchw : [N, C_in, H, W]        (PyTorch layout)
    weight : [C_out, C_in, KH, KW]  (PyTorch Conv2d layout)
    bias   : [C_out]  (unused: exactly cancelled by training-mode BN mean)
    gamma, beta : [C_out]           (BatchNorm2d affine params)
    Returns [N, C_out, H_out, W_out] float32.
    """
    del bias  # cancelled exactly by the BN mean subtraction (training mode)

    N, C_in, H, W = x_nchw.shape
    C_out, _, KH, KW = weight.shape
    H_out = (H + 2 * padding - KH) // stride + 1
    W_out = (W + 2 * padding - KW) // stride + 1

    M = N * H_out * W_out
    K = KH * KW * C_in

    LANE = 128
    Cp = _round_up(C_out, LANE)
    Kp = _round_up(K, LANE)

    budget, vmem_limit = _vmem_budget()
    resident, TM_cap, TK = _choose_pass1_tiles(Kp, Cp, budget)

    # Balanced M tiling: largest tile that fits the budget, rounded up to the
    # bf16 sublane pack (16), sized so zero-padding waste stays small.
    m_tiles = max(1, -(-M // TM_cap))
    TM = _round_up(-(-M // m_tiles), 16)
    Mp = TM * m_tiles

    # ---- glue: NCHW -> NHWC in bf16, pad, im2col (feature order kh, kw, c) --
    x = jnp.transpose(x_nchw, (0, 2, 3, 1)).astype(jnp.bfloat16)
    x = jnp.pad(x, ((0, 0), (padding, padding), (padding, padding), (0, 0)))
    cols = []
    for kh in range(KH):
        for kw in range(KW):
            cols.append(x[:, kh:kh + stride * H_out:stride,
                          kw:kw + stride * W_out:stride, :])
    patches = jnp.concatenate(cols, axis=-1).reshape(M, K)   # bf16

    patches_p = jnp.zeros((Mp, Kp), jnp.bfloat16).at[:M, :K].set(patches)
    w_mat = jnp.transpose(weight, (2, 3, 1, 0)).reshape(K, C_out)
    w_p = jnp.zeros((Kp, Cp), jnp.bfloat16).at[:K, :C_out].set(
        w_mat.astype(jnp.bfloat16))
    gamma_p = jnp.zeros((Cp,), jnp.float32).at[:C_out].set(
        gamma.astype(jnp.float32))
    beta_p = jnp.zeros((Cp,), jnp.float32).at[:C_out].set(
        beta.astype(jnp.float32))

    # ---- pass 1: tiled conv-as-matmul + per-tile channel stats --------------
    out_shapes = (jax.ShapeDtypeStruct((Mp, Cp), jnp.bfloat16),
                  jax.ShapeDtypeStruct((m_tiles, 2, Cp), jnp.float32))
    if resident:
        conv_bf16, stats = pl.pallas_call(
            _conv_stats_resident_kernel,
            out_shape=out_shapes,
            grid_spec=pltpu.PrefetchScalarGridSpec(
                num_scalar_prefetch=0,
                grid=(m_tiles,),
                in_specs=[
                    pl.BlockSpec((TM, Kp), lambda i: (i, 0)),
                    pl.BlockSpec((Kp, Cp), lambda i: (0, 0)),  # resident weight
                ],
                out_specs=[
                    pl.BlockSpec((TM, Cp), lambda i: (i, 0)),
                    pl.BlockSpec((None, 2, Cp), lambda i: (i, 0, 0)),
                ],
            ),
            compiler_params=pltpu.CompilerParams(
                dimension_semantics=("parallel",),
                vmem_limit_bytes=vmem_limit),
        )(patches_p, w_p)
    else:
        k_tiles = Kp // TK
        conv_bf16, stats = pl.pallas_call(
            _conv_stats_ktiled_kernel,
            out_shape=out_shapes,
            grid_spec=pltpu.PrefetchScalarGridSpec(
                num_scalar_prefetch=0,
                grid=(m_tiles, k_tiles),
                in_specs=[
                    pl.BlockSpec((TM, TK), lambda i, k: (i, k)),
                    pl.BlockSpec((TK, Cp), lambda i, k: (k, 0)),
                ],
                out_specs=[
                    pl.BlockSpec((TM, Cp), lambda i, k: (i, 0)),
                    pl.BlockSpec((None, 2, Cp), lambda i, k: (i, 0, 0)),
                ],
                scratch_shapes=[pltpu.VMEM((TM, Cp), jnp.float32)],
            ),
            compiler_params=pltpu.CompilerParams(
                dimension_semantics=("parallel", "arbitrary"),
                vmem_limit_bytes=vmem_limit),
        )(patches_p, w_p)

    # ---- fold BN (training-mode batch stats) into per-channel scale/shift ---
    # TODO(synk): E[x^2]-mean^2 in f32 can cancel when |mean| >> std; a shifted
    # second moment would be more robust.
    total_sum = jnp.sum(stats[:, 0, :], axis=0)          # [Cp]
    total_ssq = jnp.sum(stats[:, 1, :], axis=0)          # [Cp]
    inv_m = 1.0 / float(M)          # true M (zero-padded rows contribute 0)
    mean = total_sum * inv_m
    var = jnp.maximum(total_ssq * inv_m - mean * mean, 0.0)  # biased variance
    scale = gamma_p * jax.lax.rsqrt(var + BN_EPS)
    shift = beta_p - mean * scale
    ss_packed = jnp.stack([scale, shift], axis=0)        # [2, Cp] f32

    # ---- pass 2: folded BN + LeakyReLU, bf16 in/out, output aliases input ---
    TM2 = TM
    for f in range(m_tiles, 0, -1):
        if m_tiles % f:
            continue
        cand = TM * f
        if cand <= 8192 and 18 * cand * Cp + (1 << 16) <= budget:
            TM2 = cand
            break
    m2_tiles = Mp // TM2

    out_bf16 = pl.pallas_call(
        _bn_lrelu_kernel,
        out_shape=jax.ShapeDtypeStruct((Mp, Cp), jnp.bfloat16),
        grid_spec=pltpu.PrefetchScalarGridSpec(
            num_scalar_prefetch=0,
            grid=(m2_tiles,),
            in_specs=[
                pl.BlockSpec((TM2, Cp), lambda i: (i, 0)),
                pl.BlockSpec((2, Cp), lambda i: (0, 0)),
            ],
            out_specs=pl.BlockSpec((TM2, Cp), lambda i: (i, 0)),
        ),
        compiler_params=pltpu.CompilerParams(
            dimension_semantics=("parallel",),
            vmem_limit_bytes=vmem_limit),
        input_output_aliases={0: 0},   # overwrite the conv intermediate in HBM
    )(conv_bf16, ss_packed)

    # ---- strip padding, back to NCHW, restore f32 (fuses with the transpose)
    out = out_bf16[:M, :C_out].astype(jnp.float32)
    out = out.reshape(N, H_out, W_out, C_out)
    return jnp.transpose(out, (0, 3, 1, 2))


if __name__ == "__main__":
    # Small deterministic config consistent with the module:
    #   cnn_config = dict(kernel_size=3, stride=1, padding=1)
    N, C_in, H, W = 2, 4, 16, 16
    C_out, KH, KW = 8, 3, 3

    key = jax.random.PRNGKey(0)
    kx, kw_, kb = jax.random.split(key, 3)

    x = jax.random.normal(kx, (N, C_in, H, W), dtype=jnp.float32)
    weight = 0.1 * jax.random.normal(kw_, (C_out, C_in, KH, KW), dtype=jnp.float32)
    bias = 0.1 * jax.random.normal(kb, (C_out,), dtype=jnp.float32)
    gamma = jnp.ones((C_out,), dtype=jnp.float32)   # BatchNorm2d default init
    beta = jnp.zeros((C_out,), dtype=jnp.float32)

    out = cnn_unit_pallas(x, weight, bias, gamma, beta, stride=1, padding=1)
    out = jax.block_until_ready(out)
    assert out.shape == (N, C_out, H, W), out.shape
    assert bool(jnp.all(jnp.isfinite(out)))

    # Reference check (f32 conv + training-mode BN + LeakyReLU); loose tol
    # because the kernel uses bf16 MXU inputs and a bf16 conv intermediate.
    conv_ref = jax.lax.conv_general_dilated(
        x, weight, window_strides=(1, 1), padding=((1, 1), (1, 1)),
        dimension_numbers=("NCHW", "OIHW", "NCHW")) + bias[None, :, None, None]
    mu = jnp.mean(conv_ref, axis=(0, 2, 3), keepdims=True)
    va = jnp.mean((conv_ref - mu) ** 2, axis=(0, 2, 3), keepdims=True)
    yr = (conv_ref - mu) * jax.lax.rsqrt(va + BN_EPS)
    yr = yr * gamma[None, :, None, None] + beta[None, :, None, None]
    ref = jnp.where(yr >= 0, yr, LEAKYRELU_SLOPE * yr)
    err = float(jnp.max(jnp.abs(out - ref)))
    assert err < 0.12, f"max abs error vs reference: {err}"

    print("KERNEL_OK")
</pallas_src>

<mosaic_0001>
module attributes {stable_mosaic.version = 11 : i64} {
  func.func @_conv_stats_resident_kernel(%arg0: i32, %arg1: memref<512x128xbf16, #tpu.memory_space<vmem>>, %arg2: memref<128x128xbf16, #tpu.memory_space<vmem>>, %arg3: memref<512x128xbf16, #tpu.memory_space<vmem>>, %arg4: memref<1x2x128xf32, #tpu.memory_space<vmem>>) attributes {dimension_semantics = [#tpu.dimension_semantics<parallel>], iteration_bounds = array<i64: 1>, scalar_prefetch = 0 : i64, scratch_operands = 0 : i64, tpu.core_type = #tpu.core_type<tc>, window_params = [{transform_indices = @transform_0, window_bounds = array<i64: 512, 128>}, {pipeline_mode = #tpu.pipeline_mode<synchronous>, transform_indices = @transform_1, window_bounds = array<i64: 128, 128>}, {transform_indices = @transform_2, window_bounds = array<i64: 512, 128>}, {transform_indices = @transform_3, window_bounds = array<i64: 1, 2, 128>}]} {
    %c0 = arith.constant 0 : index
    %c0_0 = arith.constant 0 : index
    %0 = vector.load %arg1[%c0, %c0_0] : memref<512x128xbf16, #tpu.memory_space<vmem>>, vector<512x128xbf16>
    %c0_1 = arith.constant 0 : index
    %c0_2 = arith.constant 0 : index
    %1 = vector.load %arg2[%c0_1, %c0_2] : memref<128x128xbf16, #tpu.memory_space<vmem>>, vector<128x128xbf16>
    %cst = arith.constant dense<0.000000e+00> : vector<512x128xf32>
    %2 = tpu.matmul %0, %1, %cst {dimension_numbers = #tpu.dot_dimension_numbers<[1], [0], [0], [1], [0, 0, 1, 1], [], []>} : vector<512x128xbf16>, vector<128x128xbf16>, vector<512x128xf32> -> vector<512x128xf32>
    %3 = arith.truncf %2 : vector<512x128xf32> to vector<512x128xbf16>
    %c0_3 = arith.constant 0 : index
    %c0_4 = arith.constant 0 : index
    %4 = vector.load %arg3[%c0_3, %c0_4] : memref<512x128xbf16, #tpu.memory_space<vmem>>, vector<512x128xbf16>
    tpu.vector_store %arg3[%c0_3, %c0_4], %3 {strides = array<i32>} : memref<512x128xbf16, #tpu.memory_space<vmem>>, vector<512x128xbf16>,
    %cst_5 = arith.constant dense<0.000000e+00> : vector<128xf32>
    %5 = vector.multi_reduction <add>, %2, %cst_5 [0] : vector<512x128xf32> to vector<128xf32>
    %6 = vector.shape_cast %5 : vector<128xf32> to vector<1x128xf32>
    %c0_6 = arith.constant 0 : index
    %c0_7 = arith.constant 0 : index
    %c0_8 = arith.constant 0 : index
    %7 = vector.load %arg4[%c0_6, %c0_7, %c0_8] : memref<1x2x128xf32, #tpu.memory_space<vmem>>, vector<1x1x128xf32>
    %8 = vector.shape_cast %7 : vector<1x1x128xf32> to vector<1x128xf32>
    %9 = vector.shape_cast %6 : vector<1x128xf32> to vector<1x1x128xf32>
    tpu.vector_store %arg4[%c0_6, %c0_7, %c0_8], %9 {strides = array<i32>} : memref<1x2x128xf32, #tpu.memory_space<vmem>>, vector<1x1x128xf32>,
    %10 = arith.mulf %2, %2 : vector<512x128xf32>
    %cst_9 = arith.constant dense<0.000000e+00> : vector<128xf32>
    %11 = vector.multi_reduction <add>, %10, %cst_9 [0] : vector<512x128xf32> to vector<128xf32>
    %12 = vector.shape_cast %11 : vector<128xf32> to vector<1x128xf32>
    %c0_10 = arith.constant 0 : index
    %c1 = arith.constant 1 : index
    %c0_11 = arith.constant 0 : index
    %13 = vector.load %arg4[%c0_10, %c1, %c0_11] : memref<1x2x128xf32, #tpu.memory_space<vmem>>, vector<1x1x128xf32>
    %14 = vector.shape_cast %13 : vector<1x1x128xf32> to vector<1x128xf32>
    %15 = vector.shape_cast %12 : vector<1x128xf32> to vector<1x1x128xf32>
    tpu.vector_store %arg4[%c0_10, %c1, %c0_11], %15 {strides = array<i32>} : memref<1x2x128xf32, #tpu.memory_space<vmem>>, vector<1x1x128xf32>,
    return
  }
  func.func @transform_0(%arg0: i32) -> (i32, i32) {
    %c0_i32 = arith.constant 0 : i32
    %c0_i32_0 = arith.constant 0 : i32
    return %arg0, %c0_i32 : i32, i32
  }
  func.func @transform_1(%arg0: i32) -> (i32, i32) {
    %c0_i32 = arith.constant 0 : i32
    %c0_i32_0 = arith.constant 0 : i32
    %c0_i32_1 = arith.constant 0 : i32
    return %c0_i32, %c0_i32_0 : i32, i32
  }
  func.func @transform_2(%arg0: i32) -> (i32, i32) {
    %c0_i32 = arith.constant 0 : i32
    %c0_i32_0 = arith.constant 0 : i32
    return %arg0, %c0_i32 : i32, i32
  }
  func.func @transform_3(%arg0: i32) -> (i32, i32, i32) {
    %c0_i32 = arith.constant 0 : i32
    %c0_i32_0 = arith.constant 0 : i32
    %c0_i32_1 = arith.constant 0 : i32
    return %arg0, %c0_i32, %c0_i32_0 : i32, i32, i32
  }
}

module attributes {stable_mosaic.version = 11 : i64} {
  func.func @_bn_lrelu_kernel(%arg0: i32, %arg1: memref<512x128xbf16, #tpu.memory_space<vmem>>, %arg2: memref<2x128xf32, #tpu.memory_space<vmem>>, %arg3: memref<512x128xbf16, #tpu.memory_space<vmem>>) attributes {dimension_semantics = [#tpu.dimension_semantics<parallel>], iteration_bounds = array<i64: 1>, scalar_prefetch = 0 : i64, scratch_operands = 0 : i64, tpu.core_type = #tpu.core_type<tc>, window_params = [{transform_indices = @transform_0, window_bounds = array<i64: 512, 128>}, {pipeline_mode = #tpu.pipeline_mode<synchronous>, transform_indices = @transform_1, window_bounds = array<i64: 2, 128>}, {transform_indices = @transform_2, window_bounds = array<i64: 512, 128>}]} {
    %c0 = arith.constant 0 : index
    %c0_0 = arith.constant 0 : index
    %0 = vector.load %arg1[%c0, %c0_0] : memref<512x128xbf16, #tpu.memory_space<vmem>>, vector<512x128xbf16>
    %1 = arith.extf %0 : vector<512x128xbf16> to vector<512x128xf32>
    %c0_1 = arith.constant 0 : index
    %c0_2 = arith.constant 0 : index
    %2 = vector.load %arg2[%c0_1, %c0_2] : memref<2x128xf32, #tpu.memory_space<vmem>>, vector<1x128xf32>
    %3 = vector.broadcast %2 : vector<1x128xf32> to vector<512x128xf32>
    %4 = arith.mulf %1, %3 : vector<512x128xf32>
    %c1 = arith.constant 1 : index
    %c0_3 = arith.constant 0 : index
    %5 = vector.load %arg2[%c1, %c0_3] : memref<2x128xf32, #tpu.memory_space<vmem>>, vector<1x128xf32>
    %6 = vector.broadcast %5 : vector<1x128xf32> to vector<512x128xf32>
    %7 = arith.addf %4, %6 : vector<512x128xf32>
    %cst = arith.constant 0.000000e+00 : f32
    %8 = vector.broadcast %cst : f32 to vector<512x128xf32>
    %9 = arith.cmpf oge, %7, %8 : vector<512x128xf32>
    %cst_4 = arith.constant 2.000000e-01 : f32
    %10 = vector.broadcast %cst_4 : f32 to vector<512x128xf32>
    %11 = arith.mulf %10, %7 : vector<512x128xf32>
    %12 = arith.select %9, %7, %11 : vector<512x128xi1>, vector<512x128xf32>
    %13 = arith.truncf %12 : vector<512x128xf32> to vector<512x128xbf16>
    %c0_5 = arith.constant 0 : index
    %c0_6 = arith.constant 0 : index
    %14 = vector.load %arg3[%c0_5, %c0_6] : memref<512x128xbf16, #tpu.memory_space<vmem>>, vector<512x128xbf16>
    tpu.vector_store %arg3[%c0_5, %c0_6], %13 {strides = array<i32>} : memref<512x128xbf16, #tpu.memory_space<vmem>>, vector<512x128xbf16>,
    return
  }
  func.func @transform_0(%arg0: i32) -> (i32, i32) {
    %c0_i32 = arith.constant 0 : i32
    %c0_i32_0 = arith.constant 0 : i32
    return %arg0, %c0_i32 : i32, i32
  }
  func.func @transform_1(%arg0: i32) -> (i32, i32) {
    %c0_i32 = arith.constant 0 : i32
    %c0_i32_0 = arith.constant 0 : i32
    %c0_i32_1 = arith.constant 0 : i32
    return %c0_i32, %c0_i32_0 : i32, i32
  }
  func.func @transform_2(%arg0: i32) -> (i32, i32) {
    %c0_i32 = arith.constant 0 : i32
    %c0_i32_0 = arith.constant 0 : i32
    return %arg0, %c0_i32 : i32, i32
  }
}

</mosaic_0001>

<bundles_post_ra>
// kernel: cnn_unit_pallas.3
= control target key start
LH: loop header
LB: loop body
LE: loop exit
PB: predicated region body
PF: predicated region fallthrough
CT: control target
= control target key end

     0   :  { %s1619_s0 = inlined_call_operand.vmem [shape: bf16[512,128], index: 0, kind: input, shape index: {}, may-alias: {0,2}]   ;;  %s1620_s1 = inlined_call_operand.vmem [shape: f32[2,128], index: 1, kind: input, shape index: {}]   ;;  %s1621_s2 = inlined_call_operand.vmem [shape: bf16[512,128], index: 2, kind: output, shape index: {}, may-alias: {0,2}]  }
   0x1   :  { %v924_v0 = vld [vmem:[%s1619_s0] sm:$0xff]   ;;  %v1211_v4 = vld [vmem:[%s1619_s0 + $0x8] sm:$0xff]   ;;  %v1212_v5 = vld [vmem:[%s1619_s0 + $0x10] sm:$0xff]  }
   0x2   :  { %v1294_v1 = vld [vmem:[%s1620_s1] ss:$0 sm:$0xff]  ;;  %v925_v2 = vunpack.c.l.bf16 %v924_v0  ;;  %v926_v3 = vunpack.c.h.bf16 %v924_v0  ;;  %v1213_v6 = vld [vmem:[%s1619_s0 + $0x18] sm:$0xff]   ;;  %v1308_v7 = vld [vmem:[%s1620_s1 + $0x1] ss:$0 sm:$0xff]  ;;  %v929_v8 = vunpack.c.l.bf16 %v1211_v4  ;;  %v930_v9 = vunpack.c.h.bf16 %v1211_v4 }
   0x3   :  { %v933_v10 = vunpack.c.l.bf16 %v1212_v5  ;;  %v934_v11 = vunpack.c.h.bf16 %v1212_v5  ;;  %v937_v14 = vunpack.c.l.bf16 %v1213_v6  ;;  %v938_v15 = vunpack.c.h.bf16 %v1213_v6  ;;  %v1214_v34 = vld [vmem:[%s1619_s0 + $0x20] sm:$0xff]   ;;  %v1215_v35 = vld [vmem:[%s1619_s0 + $0x28] sm:$0xff]  }
   0x4   :  { %v144_v12 = vmul.f32 %v925_v2, %v1294_v1  ;;  %v145_v13 = vmul.f32 %v926_v3, %v1294_v1  ;;  %v146_v16 = vmul.f32 %v929_v8, %v1294_v1  ;;  %v147_v17 = vmul.f32 %v930_v9, %v1294_v1 }
   0x5   :  { %v148_v18 = vmul.f32 %v933_v10, %v1294_v1  ;;  %v149_v19 = vmul.f32 %v934_v11, %v1294_v1  ;;  %v150_v22 = vmul.f32 %v937_v14, %v1294_v1  ;;  %v151_v23 = vmul.f32 %v938_v15, %v1294_v1 }
   0x6   :  { %v213_v20 = vadd.f32 %v1308_v7, %v144_v12  ;;  %v214_v21 = vadd.f32 %v1308_v7, %v145_v13  ;;  %v215_v24 = vadd.f32 %v1308_v7, %v146_v16  ;;  %v216_v25 = vadd.f32 %v1308_v7, %v147_v17 }
   0x7   :  { %v217_v26 = vadd.f32 %v1308_v7, %v148_v18  ;;  %v218_v27 = vadd.f32 %v1308_v7, %v149_v19  ;;  %v219_v42 = vadd.f32 %v1308_v7, %v150_v22  ;;  %v220_v43 = vadd.f32 %v1308_v7, %v151_v23 }
   0x8   :  { %vm277_vm0 = vcmp.ge.f32.partialorder %v213_v20, 0.0  ;;  %vm278_vm1 = vcmp.ge.f32.partialorder %v214_v21, 0.0  ;;  %v341_v28 = vmul.f32 0.2, %v213_v20  ;;  %v342_v29 = vmul.f32 0.2, %v214_v21 }
   0x9   :  { %vm279_vm2 = vcmp.ge.f32.partialorder %v215_v24, 0.0  ;;  %vm280_vm3 = vcmp.ge.f32.partialorder %v216_v25, 0.0  ;;  %v343_v30 = vmul.f32 0.2, %v215_v24  ;;  %v344_v31 = vmul.f32 0.2, %v216_v25 }
   0xa   :  { %v405_v32 = vsel %vm277_vm0, %v213_v20, %v341_v28  ;;  %v406_v33 = vsel %vm278_vm1, %v214_v21, %v342_v29  ;;  %vm281_vm4 = vcmp.ge.f32.partialorder %v217_v26, 0.0  ;;  %vm282_vm5 = vcmp.ge.f32.partialorder %v218_v27, 0.0 }
   0xb   :  { %v1054_v36 = vpack.c.bf16 %v406_v33, %v405_v32  ;;  %v407_v37 = vsel %vm279_vm2, %v215_v24, %v343_v30  ;;  %v408_v38 = vsel %vm280_vm3, %v216_v25, %v344_v31  ;;  %v345_v39 = vmul.f32 0.2, %v217_v26 }
   0xc   :  { %v1059_v40 = vpack.c.bf16 %v408_v38, %v407_v37  ;;  %v346_v41 = vmul.f32 0.2, %v218_v27  ;;  %v941_v45 = vunpack.c.l.bf16 %v1214_v34  ;;  %v942_v46 = vunpack.c.h.bf16 %v1214_v34 }
   0xd   :  { %1055 = vst [vmem:[%s1621_s2] sm:$0xff] %v1054_v36   ;;  %v409_v44 = vsel %vm281_vm4, %v217_v26, %v345_v39  ;;  %v945_v47 = vunpack.c.l.bf16 %v1215_v35  ;;  %vm283_vm6 = vcmp.ge.f32.partialorder %v219_v42, 0.0  ;;  %vm284_vm7 = vcmp.ge.f32.partialorder %v220_v43, 0.0 }
   0xe   :  { %v410_v49 = vsel %vm282_vm5, %v218_v27, %v346_v41  ;;  %v347_v50 = vmul.f32 0.2, %v219_v42  ;;  %v348_v52 = vmul.f32 0.2, %v220_v43  ;;  %v152_v53 = vmul.f32 %v941_v45, %v1294_v1 }
   0xf   :  { %v1064_v51 = vpack.c.bf16 %v410_v49, %v409_v44  ;;  %v153_v54 = vmul.f32 %v942_v46, %v1294_v1  ;;  %v946_v56 = vunpack.c.h.bf16 %v1215_v35  ;;  %v154_v57 = vmul.f32 %v945_v47, %v1294_v1 }
  0x10   :  { %v411_v55 = vsel %vm283_vm6, %v219_v42, %v347_v50  ;;  %v412_v59 = vsel %vm284_vm7, %v220_v43, %v348_v52  ;;  %v221_v60 = vadd.f32 %v1308_v7, %v152_v53 }
  0x11   :  { %v222_v61 = vadd.f32 %v1308_v7, %v153_v54  ;;  %v1069_v63 = vpack.c.bf16 %v412_v59, %v411_v55  ;;  %v155_v0 = vmul.f32 %v946_v56, %v1294_v1  ;;  %v223_v2 = vadd.f32 %v1308_v7, %v154_v57 }
  0x12   :  { %vm285_vm8 = vcmp.ge.f32.partialorder %v221_v60, 0.0  ;;  %v349_v5 = vmul.f32 0.2, %v221_v60 }
  0x13   :  { %vm286_vm9 = vcmp.ge.f32.partialorder %v222_v61, 0.0  ;;  %v350_v6 = vmul.f32 0.2, %v222_v61  ;;  %v224_v8 = vadd.f32 %v1308_v7, %v155_v0  ;;  %vm287_vm10 = vcmp.ge.f32.partialorder %v223_v2, 0.0 }
  0x14   :  { %v1216_v48 = vld [vmem:[%s1619_s0 + $0x30] sm:$0xff]   ;;  %v351_v9 = vmul.f32 0.2, %v223_v2  ;;  %v413_v11 = vsel %vm285_vm8, %v221_v60, %v349_v5 }
  0x15   :  { %1242 = vst [vmem:[%s1621_s2 + $0x8] sm:$0xff] %v1059_v40   ;;  %v949_v58 = vunpack.c.l.bf16 %v1216_v48  ;;  %1243 = vst [vmem:[%s1621_s2 + $0x10] sm:$0xff] %v1064_v51   ;;  %v950_v62 = vunpack.c.h.bf16 %v1216_v48  ;;  %v414_v12 = vsel %vm286_vm9, %v222_v61, %v350_v6  ;;  %vm288_vm11 = vcmp.ge.f32.partialorder %v224_v8, 0.0 }
  0x16   :  { %v1074_v16 = vpack.c.bf16 %v414_v12, %v413_v11  ;;  %v352_v17 = vmul.f32 0.2, %v224_v8  ;;  %v415_v18 = vsel %vm287_vm10, %v223_v2, %v351_v9 }
  0x17   :  { %v156_v3 = vmul.f32 %v949_v58, %v1294_v1  ;;  %v157_v10 = vmul.f32 %v950_v62, %v1294_v1 }
  0x18   :  { %v416_v22 = vsel %vm288_vm11, %v224_v8, %v352_v17 }
  0x19   :  { %v225_v13 = vadd.f32 %v1308_v7, %v156_v3  ;;  %v226_v19 = vadd.f32 %v1308_v7, %v157_v10  ;;  %v1079_v28 = vpack.c.bf16 %v416_v22, %v415_v18 }
  0x1b   :  { %vm289_vm12 = vcmp.ge.f32.partialorder %v225_v13, 0.0  ;;  %v353_v20 = vmul.f32 0.2, %v225_v13  ;;  %vm290_vm13 = vcmp.ge.f32.partialorder %v226_v19, 0.0  ;;  %v354_v29 = vmul.f32 0.2, %v226_v19 }
  0x1c   :  { %v1217_v4 = vld [vmem:[%s1619_s0 + $0x38] sm:$0xff]  }
  0x1d   :  { %1244 = vst [vmem:[%s1621_s2 + $0x18] sm:$0xff] %v1069_v63   ;;  %v953_v14 = vunpack.c.l.bf16 %v1217_v4  ;;  %v954_v21 = vunpack.c.h.bf16 %v1217_v4  ;;  %v417_v30 = vsel %vm289_vm12, %v225_v13, %v353_v20  ;;  %v418_v35 = vsel %vm290_vm13, %v226_v19, %v354_v29 }
  0x1e   :  { %v1084_v39 = vpack.c.bf16 %v418_v35, %v417_v30 }
  0x1f   :  { %v158_v23 = vmul.f32 %v953_v14, %v1294_v1  ;;  %v159_v31 = vmul.f32 %v954_v21, %v1294_v1 }
  0x21   :  { %v227_v32 = vadd.f32 %v1308_v7, %v158_v23  ;;  %v228_v40 = vadd.f32 %v1308_v7, %v159_v31 }
  0x23   :  { %vm291_vm14 = vcmp.ge.f32.partialorder %v227_v32, 0.0  ;;  %v355_v41 = vmul.f32 0.2, %v227_v32  ;;  %vm292_vm15 = vcmp.ge.f32.partialorder %v228_v40, 0.0  ;;  %v356_v46 = vmul.f32 0.2, %v228_v40 }
  0x24   :  { %v1218_v15 = vld [vmem:[%s1619_s0 + $0x40] sm:$0xff]  }
  0x25   :  { %1245 = vst [vmem:[%s1621_s2 + $0x20] sm:$0xff] %v1074_v16   ;;  %v957_v24 = vunpack.c.l.bf16 %v1218_v15  ;;  %v958_v25 = vunpack.c.h.bf16 %v1218_v15  ;;  %v419_v47 = vsel %vm291_vm14, %v227_v32, %v355_v41  ;;  %v420_v51 = vsel %vm292_vm15, %v228_v40, %v356_v46 }
  0x26   :  { %v1089_v56 = vpack.c.bf16 %v420_v51, %v419_v47 }
  0x27   :  { %v160_v33 = vmul.f32 %v957_v24, %v1294_v1  ;;  %v161_v34 = vmul.f32 %v958_v25, %v1294_v1 }
  0x29   :  { %v229_v42 = vadd.f32 %v1308_v7, %v160_v33  ;;  %v230_v43 = vadd.f32 %v1308_v7, %v161_v34 }
  0x2b   :  { %vm293_vm0 = vcmp.ge.f32.partialorder %v229_v42, 0.0  ;;  %vm294_vm1 = vcmp.ge.f32.partialorder %v230_v43, 0.0  ;;  %v357_v49 = vmul.f32 0.2, %v229_v42  ;;  %v358_v50 = vmul.f32 0.2, %v230_v43 }
  0x2c   :  { %v1219_v26 = vld [vmem:[%s1619_s0 + $0x48] sm:$0xff]   ;;  %v1220_v27 = vld [vmem:[%s1619_s0 + $0x50] sm:$0xff]  }
  0x2d   :  { %1246 = vst [vmem:[%s1621_s2 + $0x28] sm:$0xff] %v1079_v28   ;;  %v961_v36 = vunpack.c.l.bf16 %v1219_v26  ;;  %v962_v37 = vunpack.c.h.bf16 %v1219_v26  ;;  %v965_v38 = vunpack.c.l.bf16 %v1220_v27  ;;  %1247 = vst [vmem:[%s1621_s2 + $0x30] sm:$0xff] %v1084_v39   ;;  %v966_v48 = vunpack.c.h.bf16 %v1220_v27 }
  0x2e   :  { %v421_v57 = vsel %vm293_vm0, %v229_v42, %v357_v49  ;;  %v422_v58 = vsel %vm294_vm1, %v230_v43, %v358_v50 }
  0x2f   :  { %v162_v44 = vmul.f32 %v961_v36, %v1294_v1  ;;  %v163_v45 = vmul.f32 %v962_v37, %v1294_v1  ;;  %v164_v54 = vmul.f32 %v965_v38, %v1294_v1  ;;  %v165_v59 = vmul.f32 %v966_v48, %v1294_v1 }
  0x30   :  { %v1094_v61 = vpack.c.bf16 %v422_v58, %v421_v57 }
  0x31   :  { %v231_v52 = vadd.f32 %v1308_v7, %v162_v44  ;;  %v232_v53 = vadd.f32 %v1308_v7, %v163_v45  ;;  %v233_v0 = vadd.f32 %v1308_v7, %v164_v54  ;;  %v234_v2 = vadd.f32 %v1308_v7, %v165_v59 }
  0x33   :  { %vm295_vm2 = vcmp.ge.f32.partialorder %v231_v52, 0.0  ;;  %vm296_vm3 = vcmp.ge.f32.partialorder %v232_v53, 0.0  ;;  %v359_v62 = vmul.f32 0.2, %v231_v52  ;;  %v360_v63 = vmul.f32 0.2, %v232_v53 }
  0x34   :  { %v1221_v55 = vld [vmem:[%s1619_s0 + $0x58] sm:$0xff]   ;;  %v1222_v60 = vld [vmem:[%s1619_s0 + $0x60] sm:$0xff]   ;;  %vm297_vm4 = vcmp.ge.f32.partialorder %v233_v0, 0.0  ;;  %vm298_vm5 = vcmp.ge.f32.partialorder %v234_v2, 0.0  ;;  %v361_v11 = vmul.f32 0.2, %v233_v0 }
  0x35   :  { %1248 = vst [vmem:[%s1621_s2 + $0x38] sm:$0xff] %v1089_v56   ;;  %v969_v3 = vunpack.c.l.bf16 %v1221_v55  ;;  %1249 = vst [vmem:[%s1621_s2 + $0x40] sm:$0xff] %v1094_v61   ;;  %v423_v4 = vsel %vm295_vm2, %v231_v52, %v359_v62  ;;  %v970_v5 = vunpack.c.h.bf16 %v1221_v55  ;;  %v973_v6 = vunpack.c.l.bf16 %v1222_v60 }
  0x36   :  { %v974_v8 = vunpack.c.h.bf16 %v1222_v60  ;;  %v424_v10 = vsel %vm296_vm3, %v232_v53, %v360_v63  ;;  %v362_v13 = vmul.f32 0.2, %v234_v2  ;;  %v425_v16 = vsel %vm297_vm4, %v233_v0, %v361_v11 }
  0x37   :  { %v1099_v12 = vpack.c.bf16 %v424_v10, %v423_v4  ;;  %v166_v14 = vmul.f32 %v969_v3, %v1294_v1  ;;  %v167_v15 = vmul.f32 %v970_v5, %v1294_v1  ;;  %v168_v17 = vmul.f32 %v973_v6, %v1294_v1 }
  0x38   :  { %v169_v18 = vmul.f32 %v974_v8, %v1294_v1  ;;  %v426_v20 = vsel %vm298_vm5, %v234_v2, %v362_v13 }
  0x39   :  { %v235_v21 = vadd.f32 %v1308_v7, %v166_v14  ;;  %v236_v22 = vadd.f32 %v1308_v7, %v167_v15  ;;  %v1104_v24 = vpack.c.bf16 %v426_v20, %v425_v16  ;;  %v237_v25 = vadd.f32 %v1308_v7, %v168_v17 }
  0x3a   :  { %v238_v26 = vadd.f32 %v1308_v7, %v169_v18 }
  0x3b   :  { %vm299_vm6 = vcmp.ge.f32.partialorder %v235_v21, 0.0  ;;  %vm300_vm7 = vcmp.ge.f32.partialorder %v236_v22, 0.0  ;;  %v363_v29 = vmul.f32 0.2, %v235_v21  ;;  %v364_v30 = vmul.f32 0.2, %v236_v22 }
  0x3c   :  { %v1223_v9 = vld [vmem:[%s1619_s0 + $0x68] sm:$0xff]   ;;  %vm301_vm8 = vcmp.ge.f32.partialorder %v237_v25, 0.0  ;;  %vm302_vm9 = vcmp.ge.f32.partialorder %v238_v26, 0.0  ;;  %v365_v31 = vmul.f32 0.2, %v237_v25 }
  0x3d   :  { %v977_v19 = vunpack.c.l.bf16 %v1223_v9  ;;  %1250 = vst [vmem:[%s1621_s2 + $0x48] sm:$0xff] %v1099_v12   ;;  %v978_v23 = vunpack.c.h.bf16 %v1223_v9  ;;  %v366_v32 = vmul.f32 0.2, %v238_v26  ;;  %v427_v33 = vsel %vm299_vm6, %v235_v21, %v363_v29 }
  0x3e   :  { %v428_v34 = vsel %vm300_vm7, %v236_v22, %v364_v30  ;;  %v429_v39 = vsel %vm301_vm8, %v237_v25, %v365_v31 }
  0x3f   :  { %v170_v27 = vmul.f32 %v977_v19, %v1294_v1  ;;  %v171_v35 = vmul.f32 %v978_v23, %v1294_v1  ;;  %v1109_v38 = vpack.c.bf16 %v428_v34, %v427_v33  ;;  %v430_v40 = vsel %vm302_vm9, %v238_v26, %v366_v32 }
  0x40   :  { %v1114_v43 = vpack.c.bf16 %v430_v40, %v429_v39 }
  0x41   :  { %v239_v36 = vadd.f32 %v1308_v7, %v170_v27  ;;  %v240_v44 = vadd.f32 %v1308_v7, %v171_v35 }
  0x43   :  { %vm303_vm10 = vcmp.ge.f32.partialorder %v239_v36, 0.0  ;;  %v367_v45 = vmul.f32 0.2, %v239_v36  ;;  %vm304_vm11 = vcmp.ge.f32.partialorder %v240_v44, 0.0  ;;  %v368_v51 = vmul.f32 0.2, %v240_v44 }
  0x44   :  { %v1224_v28 = vld [vmem:[%s1619_s0 + $0x70] sm:$0xff]  }
  0x45   :  { %1251 = vst [vmem:[%s1621_s2 + $0x50] sm:$0xff] %v1104_v24   ;;  %v981_v41 = vunpack.c.l.bf16 %v1224_v28  ;;  %v982_v46 = vunpack.c.h.bf16 %v1224_v28  ;;  %v431_v52 = vsel %vm303_vm10, %v239_v36, %v367_v45  ;;  %v432_v58 = vsel %vm304_vm11, %v240_v44, %v368_v51 }
  0x46   :  { %v1119_v62 = vpack.c.bf16 %v432_v58, %v431_v52 }
  0x47   :  { %v172_v47 = vmul.f32 %v981_v41, %v1294_v1  ;;  %v173_v54 = vmul.f32 %v982_v46, %v1294_v1 }
  0x49   :  { %v241_v55 = vadd.f32 %v1308_v7, %v172_v47  ;;  %v242_v63 = vadd.f32 %v1308_v7, %v173_v54 }
  0x4b   :  { %vm305_vm12 = vcmp.ge.f32.partialorder %v241_v55, 0.0  ;;  %v369_v0 = vmul.f32 0.2, %v241_v55  ;;  %vm306_vm13 = vcmp.ge.f32.partialorder %v242_v63, 0.0  ;;  %v370_v6 = vmul.f32 0.2, %v242_v63 }
  0x4c   :  { %v1225_v37 = vld [vmem:[%s1619_s0 + $0x78] sm:$0xff]   ;;  %v1226_v42 = vld [vmem:[%s1619_s0 + $0x80] sm:$0xff]  }
  0x4d   :  { %1252 = vst [vmem:[%s1621_s2 + $0x58] sm:$0xff] %v1109_v38   ;;  %v985_v48 = vunpack.c.l.bf16 %v1225_v37  ;;  %v986_v49 = vunpack.c.h.bf16 %v1225_v37  ;;  %v989_v53 = vunpack.c.l.bf16 %v1226_v42  ;;  %v990_v59 = vunpack.c.h.bf16 %v1226_v42 }
  0x4e   :  { %v433_v8 = vsel %vm305_vm12, %v241_v55, %v369_v0  ;;  %v434_v12 = vsel %vm306_vm13, %v242_v63, %v370_v6 }
  0x4f   :  { %v174_v56 = vmul.f32 %v985_v48, %v1294_v1  ;;  %v175_v57 = vmul.f32 %v986_v49, %v1294_v1  ;;  %v176_v60 = vmul.f32 %v989_v53, %v1294_v1  ;;  %v177_v4 = vmul.f32 %v990_v59, %v1294_v1 }
  0x50   :  { %v1124_v16 = vpack.c.bf16 %v434_v12, %v433_v8 }
  0x51   :  { %v243_v2 = vadd.f32 %v1308_v7, %v174_v56  ;;  %v244_v3 = vadd.f32 %v1308_v7, %v175_v57  ;;  %v245_v5 = vadd.f32 %v1308_v7, %v176_v60  ;;  %v246_v13 = vadd.f32 %v1308_v7, %v177_v4 }
  0x53   :  { %vm307_vm14 = vcmp.ge.f32.partialorder %v243_v2, 0.0  ;;  %vm308_vm15 = vcmp.ge.f32.partialorder %v244_v3, 0.0  ;;  %v371_v10 = vmul.f32 0.2, %v243_v2  ;;  %v372_v11 = vmul.f32 0.2, %v244_v3 }
  0x54   :  { %v1227_v50 = vld [vmem:[%s1619_s0 + $0x88] sm:$0xff]   ;;  %vm309_vm0 = vcmp.ge.f32.partialorder %v245_v5, 0.0  ;;  %v373_v14 = vmul.f32 0.2, %v245_v5  ;;  %vm310_vm1 = vcmp.ge.f32.partialorder %v246_v13, 0.0 }
  0x55   :  { %1253 = vst [vmem:[%s1621_s2 + $0x60] sm:$0xff] %v1114_v43   ;;  %v993_v61 = vunpack.c.l.bf16 %v1227_v50  ;;  %1254 = vst [vmem:[%s1621_s2 + $0x68] sm:$0xff] %v1119_v62   ;;  %v994_v9 = vunpack.c.h.bf16 %v1227_v50  ;;  %v435_v17 = vsel %vm307_vm14, %v243_v2, %v371_v10  ;;  %v436_v18 = vsel %vm308_vm15, %v244_v3, %v372_v11 }
  0x56   :  { %v1129_v22 = vpack.c.bf16 %v436_v18, %v435_v17  ;;  %v374_v23 = vmul.f32 0.2, %v246_v13  ;;  %v437_v24 = vsel %vm309_vm0, %v245_v5, %v373_v14 }
  0x57   :  { %v178_v19 = vmul.f32 %v993_v61, %v1294_v1  ;;  %v179_v25 = vmul.f32 %v994_v9, %v1294_v1 }
  0x58   :  { %v438_v29 = vsel %vm310_vm1, %v246_v13, %v374_v23 }
  0x59   :  { %v247_v26 = vadd.f32 %v1308_v7, %v178_v19  ;;  %v1134_v33 = vpack.c.bf16 %v438_v29, %v437_v24  ;;  %v248_v34 = vadd.f32 %v1308_v7, %v179_v25 }
  0x5b   :  { %vm311_vm2 = vcmp.ge.f32.partialorder %v247_v26, 0.0  ;;  %v375_v35 = vmul.f32 0.2, %v247_v26  ;;  %vm312_vm3 = vcmp.ge.f32.partialorder %v248_v34, 0.0  ;;  %v376_v41 = vmul.f32 0.2, %v248_v34 }
  0x5c   :  { %v1228_v15 = vld [vmem:[%s1619_s0 + $0x90] sm:$0xff]   ;;  %v1229_v20 = vld [vmem:[%s1619_s0 + $0x98] sm:$0xff]   ;;  %v1230_v21 = vld [vmem:[%s1619_s0 + $0xa0] sm:$0xff]  }
  0x5d   :  { %1255 = vst [vmem:[%s1621_s2 + $0x70] sm:$0xff] %v1124_v16   ;;  %v997_v27 = vunpack.c.l.bf16 %v1228_v15  ;;  %v998_v28 = vunpack.c.h.bf16 %v1228_v15  ;;  %1256 = vst [vmem:[%s1621_s2 + $0x78] sm:$0xff] %v1129_v22   ;;  %v1001_v30 = vunpack.c.l.bf16 %v1229_v20  ;;  %v1002_v31 = vunpack.c.h.bf16 %v1229_v20 }
  0x5e   :  { %v1005_v32 = vunpack.c.l.bf16 %v1230_v21  ;;  %v439_v42 = vsel %vm311_vm2, %v247_v26, %v375_v35  ;;  %v1006_v43 = vunpack.c.h.bf16 %v1230_v21  ;;  %v440_v48 = vsel %vm312_vm3, %v248_v34, %v376_v41 }
  0x5f   :  { %v180_v36 = vmul.f32 %v997_v27, %v1294_v1  ;;  %v181_v37 = vmul.f32 %v998_v28, %v1294_v1  ;;  %v182_v38 = vmul.f32 %v1001_v30, %v1294_v1  ;;  %v183_v39 = vmul.f32 %v1002_v31, %v1294_v1 }
  0x60   :  { %v184_v49 = vmul.f32 %v1005_v32, %v1294_v1  ;;  %v185_v50 = vmul.f32 %v1006_v43, %v1294_v1  ;;  %v1139_v52 = vpack.c.bf16 %v440_v48, %v439_v42 }
  0x61   :  { %v249_v44 = vadd.f32 %v1308_v7, %v180_v36  ;;  %v250_v45 = vadd.f32 %v1308_v7, %v181_v37  ;;  %v251_v46 = vadd.f32 %v1308_v7, %v182_v38  ;;  %v252_v47 = vadd.f32 %v1308_v7, %v183_v39 }
  0x62   :  { %v253_v58 = vadd.f32 %v1308_v7, %v184_v49  ;;  %v254_v59 = vadd.f32 %v1308_v7, %v185_v50 }
  0x63   :  { %vm313_vm4 = vcmp.ge.f32.partialorder %v249_v44, 0.0  ;;  %vm314_vm5 = vcmp.ge.f32.partialorder %v250_v45, 0.0  ;;  %v377_v53 = vmul.f32 0.2, %v249_v44  ;;  %v378_v54 = vmul.f32 0.2, %v250_v45 }
  0x64   :  { %v1231_v40 = vld [vmem:[%s1619_s0 + $0xa8] sm:$0xff]   ;;  %vm315_vm6 = vcmp.ge.f32.partialorder %v251_v46, 0.0  ;;  %vm316_vm7 = vcmp.ge.f32.partialorder %v252_v47, 0.0  ;;  %v379_v55 = vmul.f32 0.2, %v251_v46  ;;  %vm317_vm8 = vcmp.ge.f32.partialorder %v253_v58, 0.0 }
  0x65   :  { %1257 = vst [vmem:[%s1621_s2 + $0x80] sm:$0xff] %v1134_v33   ;;  %v1009_v51 = vunpack.c.l.bf16 %v1231_v40  ;;  %1258 = vst [vmem:[%s1621_s2 + $0x88] sm:$0xff] %v1139_v52   ;;  %v441_v56 = vsel %vm313_vm4, %v249_v44, %v377_v53  ;;  %v380_v57 = vmul.f32 0.2, %v252_v47  ;;  %v442_v60 = vsel %vm314_vm5, %v250_v45, %v378_v54 }
  0x66   :  { %v443_v61 = vsel %vm315_vm6, %v251_v46, %v379_v55  ;;  %v1010_v62 = vunpack.c.h.bf16 %v1231_v40  ;;  %v1144_v3 = vpack.c.bf16 %v442_v60, %v441_v56  ;;  %vm318_vm9 = vcmp.ge.f32.partialorder %v254_v59, 0.0 }
  0x67   :  { %v186_v63 = vmul.f32 %v1009_v51, %v1294_v1  ;;  %v444_v4 = vsel %vm316_vm7, %v252_v47, %v380_v57  ;;  %v381_v6 = vmul.f32 0.2, %v253_v58  ;;  %v382_v8 = vmul.f32 0.2, %v254_v59 }
  0x68   :  { %v1149_v5 = vpack.c.bf16 %v444_v4, %v443_v61  ;;  %v187_v9 = vmul.f32 %v1010_v62, %v1294_v1 }
  0x69   :  { %v255_v10 = vadd.f32 %v1308_v7, %v186_v63  ;;  %v445_v14 = vsel %vm317_vm8, %v253_v58, %v381_v6  ;;  %v446_v15 = vsel %vm318_vm9, %v254_v59, %v382_v8 }
  0x6a   :  { %v256_v16 = vadd.f32 %v1308_v7, %v187_v9  ;;  %v1154_v19 = vpack.c.bf16 %v446_v15, %v445_v14 }
  0x6b   :  { %vm319_vm10 = vcmp.ge.f32.partialorder %v255_v10, 0.0  ;;  %v383_v20 = vmul.f32 0.2, %v255_v10 }
  0x6c   :  { %v1232_v0 = vld [vmem:[%s1619_s0 + $0xb0] sm:$0xff]   ;;  %v1233_v2 = vld [vmem:[%s1619_s0 + $0xb8] sm:$0xff]   ;;  %vm320_vm11 = vcmp.ge.f32.partialorder %v256_v16, 0.0  ;;  %v384_v22 = vmul.f32 0.2, %v256_v16 }
  0x6d   :  { %1259 = vst [vmem:[%s1621_s2 + $0x90] sm:$0xff] %v1144_v3   ;;  %v1013_v11 = vunpack.c.l.bf16 %v1232_v0  ;;  %v1014_v12 = vunpack.c.h.bf16 %v1232_v0  ;;  %v1017_v13 = vunpack.c.l.bf16 %v1233_v2  ;;  %1260 = vst [vmem:[%s1621_s2 + $0x98] sm:$0xff] %v1149_v5   ;;  %v1018_v17 = vunpack.c.h.bf16 %v1233_v2 }
  0x6e   :  { %v447_v25 = vsel %vm319_vm10, %v255_v10, %v383_v20  ;;  %v448_v29 = vsel %vm320_vm11, %v256_v16, %v384_v22 }
  0x6f   :  { %v188_v21 = vmul.f32 %v1013_v11, %v1294_v1  ;;  %v189_v23 = vmul.f32 %v1014_v12, %v1294_v1  ;;  %v190_v24 = vmul.f32 %v1017_v13, %v1294_v1  ;;  %v191_v27 = vmul.f32 %v1018_v17, %v1294_v1 }
  0x70   :  { %v1159_v33 = vpack.c.bf16 %v448_v29, %v447_v25 }
  0x71   :  { %v257_v26 = vadd.f32 %v1308_v7, %v188_v21  ;;  %v258_v30 = vadd.f32 %v1308_v7, %v189_v23  ;;  %v259_v31 = vadd.f32 %v1308_v7, %v190_v24  ;;  %v260_v35 = vadd.f32 %v1308_v7, %v191_v27 }
  0x73   :  { %vm321_vm12 = vcmp.ge.f32.partialorder %v257_v26, 0.0  ;;  %v385_v34 = vmul.f32 0.2, %v257_v26  ;;  %vm322_vm13 = vcmp.ge.f32.partialorder %v258_v30, 0.0  ;;  %v386_v37 = vmul.f32 0.2, %v258_v30 }
  0x74   :  { %v1234_v18 = vld [vmem:[%s1619_s0 + $0xc0] sm:$0xff]   ;;  %vm323_vm14 = vcmp.ge.f32.partialorder %v259_v31, 0.0  ;;  %v387_v38 = vmul.f32 0.2, %v259_v31  ;;  %vm324_vm15 = vcmp.ge.f32.partialorder %v260_v35, 0.0 }
  0x75   :  { %1261 = vst [vmem:[%s1621_s2 + $0xa0] sm:$0xff] %v1154_v19   ;;  %v1021_v28 = vunpack.c.l.bf16 %v1234_v18  ;;  %v1022_v32 = vunpack.c.h.bf16 %v1234_v18  ;;  %v449_v39 = vsel %vm321_vm12, %v257_v26, %v385_v34  ;;  %v388_v40 = vmul.f32 0.2, %v260_v35 }
  0x76   :  { %v450_v43 = vsel %vm322_vm13, %v258_v30, %v386_v37  ;;  %v451_v44 = vsel %vm323_vm14, %v259_v31, %v387_v38 }
  0x77   :  { %v192_v41 = vmul.f32 %v1021_v28, %v1294_v1  ;;  %v193_v45 = vmul.f32 %v1022_v32, %v1294_v1  ;;  %v1164_v47 = vpack.c.bf16 %v450_v43, %v449_v39  ;;  %v452_v48 = vsel %vm324_vm15, %v260_v35, %v388_v40 }
  0x78   :  { %v1169_v51 = vpack.c.bf16 %v452_v48, %v451_v44 }
  0x79   :  { %v261_v49 = vadd.f32 %v1308_v7, %v192_v41  ;;  %v262_v52 = vadd.f32 %v1308_v7, %v193_v45 }
  0x7b   :  { %vm325_vm0 = vcmp.ge.f32.partialorder %v261_v49, 0.0  ;;  %v389_v56 = vmul.f32 0.2, %v261_v49  ;;  %vm326_vm1 = vcmp.ge.f32.partialorder %v262_v52, 0.0  ;;  %v390_v59 = vmul.f32 0.2, %v262_v52 }
  0x7c   :  { %v1235_v36 = vld [vmem:[%s1619_s0 + $0xc8] sm:$0xff]  }
  0x7d   :  { %1262 = vst [vmem:[%s1621_s2 + $0xa8] sm:$0xff] %v1159_v33   ;;  %v1025_v46 = vunpack.c.l.bf16 %v1235_v36  ;;  %v1026_v50 = vunpack.c.h.bf16 %v1235_v36  ;;  %v453_v62 = vsel %vm325_vm0, %v261_v49, %v389_v56  ;;  %v454_v3 = vsel %vm326_vm1, %v262_v52, %v390_v59 }
  0x7e   :  { %v1174_v6 = vpack.c.bf16 %v454_v3, %v453_v62 }
  0x7f   :  { %v194_v53 = vmul.f32 %v1025_v46, %v1294_v1  ;;  %v195_v57 = vmul.f32 %v1026_v50, %v1294_v1 }
  0x81   :  { %v263_v60 = vadd.f32 %v1308_v7, %v194_v53  ;;  %v264_v63 = vadd.f32 %v1308_v7, %v195_v57 }
  0x83   :  { %vm327_vm2 = vcmp.ge.f32.partialorder %v263_v60, 0.0  ;;  %v391_v4 = vmul.f32 0.2, %v263_v60  ;;  %vm328_vm3 = vcmp.ge.f32.partialorder %v264_v63, 0.0  ;;  %v392_v8 = vmul.f32 0.2, %v264_v63 }
  0x84   :  { %v1236_v42 = vld [vmem:[%s1619_s0 + $0xd0] sm:$0xff]   ;;  %v1237_v55 = vld [vmem:[%s1619_s0 + $0xd8] sm:$0xff]  }
  0x85   :  { %v1029_v54 = vunpack.c.l.bf16 %v1236_v42  ;;  %1263 = vst [vmem:[%s1621_s2 + $0xb0] sm:$0xff] %v1164_v47   ;;  %v1030_v58 = vunpack.c.h.bf16 %v1236_v42  ;;  %1264 = vst [vmem:[%s1621_s2 + $0xb8] sm:$0xff] %v1169_v51   ;;  %v1033_v2 = vunpack.c.l.bf16 %v1237_v55  ;;  %v455_v11 = vsel %vm327_vm2, %v263_v60, %v391_v4 }
  0x86   :  { %v1034_v13 = vunpack.c.h.bf16 %v1237_v55  ;;  %v456_v15 = vsel %vm328_vm3, %v264_v63, %v392_v8 }
  0x87   :  { %v196_v61 = vmul.f32 %v1029_v54, %v1294_v1  ;;  %v197_v0 = vmul.f32 %v1030_v58, %v1294_v1  ;;  %v198_v17 = vmul.f32 %v1033_v2, %v1294_v1  ;;  %v1179_v18 = vpack.c.bf16 %v456_v15, %v455_v11 }
  0x88   :  { %v199_v20 = vmul.f32 %v1034_v13, %v1294_v1 }
  0x89   :  { %v265_v5 = vadd.f32 %v1308_v7, %v196_v61  ;;  %v266_v9 = vadd.f32 %v1308_v7, %v197_v0  ;;  %v267_v23 = vadd.f32 %v1308_v7, %v198_v17 }
  0x8a   :  { %v268_v27 = vadd.f32 %v1308_v7, %v199_v20 }
  0x8b   :  { %vm329_vm4 = vcmp.ge.f32.partialorder %v265_v5, 0.0  ;;  %v393_v12 = vmul.f32 0.2, %v265_v5  ;;  %vm330_vm5 = vcmp.ge.f32.partialorder %v266_v9, 0.0  ;;  %v394_v16 = vmul.f32 0.2, %v266_v9 }
  0x8c   :  { %v1238_v10 = vld [vmem:[%s1619_s0 + $0xe0] sm:$0xff]   ;;  %v1239_v14 = vld [vmem:[%s1619_s0 + $0xe8] sm:$0xff]   ;;  %vm331_vm6 = vcmp.ge.f32.partialorder %v267_v23, 0.0  ;;  %v395_v31 = vmul.f32 0.2, %v267_v23  ;;  %vm332_vm7 = vcmp.ge.f32.partialorder %v268_v27, 0.0 }
  0x8d   :  { %1265 = vst [vmem:[%s1621_s2 + $0xc0] sm:$0xff] %v1174_v6   ;;  %v457_v19 = vsel %vm329_vm4, %v265_v5, %v393_v12  ;;  %v1037_v21 = vunpack.c.l.bf16 %v1238_v10  ;;  %v458_v22 = vsel %vm330_vm5, %v266_v9, %v394_v16  ;;  %v1038_v24 = vunpack.c.h.bf16 %v1238_v10  ;;  %1266 = vst [vmem:[%s1621_s2 + $0xc8] sm:$0xff] %v1179_v18  }
  0x8e   :  { %v1041_v25 = vunpack.c.l.bf16 %v1239_v14  ;;  %v1184_v26 = vpack.c.bf16 %v458_v22, %v457_v19  ;;  %v1042_v29 = vunpack.c.h.bf16 %v1239_v14  ;;  %v396_v34 = vmul.f32 0.2, %v268_v27 }
  0x8f   :  { %v200_v28 = vmul.f32 %v1037_v21, %v1294_v1  ;;  %v201_v32 = vmul.f32 %v1038_v24, %v1294_v1  ;;  %v459_v37 = vsel %vm331_vm6, %v267_v23, %v395_v31 }
  0x90   :  { %v202_v33 = vmul.f32 %v1041_v25, %v1294_v1  ;;  %v203_v36 = vmul.f32 %v1042_v29, %v1294_v1  ;;  %v460_v41 = vsel %vm332_vm7, %v268_v27, %v396_v34 }
  0x91   :  { %v269_v35 = vadd.f32 %v1308_v7, %v200_v28  ;;  %v270_v38 = vadd.f32 %v1308_v7, %v201_v32  ;;  %v1189_v45 = vpack.c.bf16 %v460_v41, %v459_v37 }
  0x92   :  { %v271_v39 = vadd.f32 %v1308_v7, %v202_v33  ;;  %v272_v43 = vadd.f32 %v1308_v7, %v203_v36 }
  0x93   :  { %vm333_vm8 = vcmp.ge.f32.partialorder %v269_v35, 0.0  ;;  %v397_v42 = vmul.f32 0.2, %v269_v35  ;;  %vm334_vm9 = vcmp.ge.f32.partialorder %v270_v38, 0.0  ;;  %v398_v46 = vmul.f32 0.2, %v270_v38 }
  0x94   :  { %v1240_v30 = vld [vmem:[%s1619_s0 + $0xf0] sm:$0xff]   ;;  %vm335_vm10 = vcmp.ge.f32.partialorder %v271_v39, 0.0  ;;  %vm336_vm11 = vcmp.ge.f32.partialorder %v272_v43, 0.0  ;;  %v399_v48 = vmul.f32 0.2, %v271_v39 }
  0x95   :  { %1267 = vst [vmem:[%s1621_s2 + $0xd0] sm:$0xff] %v1184_v26   ;;  %v1045_v40 = vunpack.c.l.bf16 %v1240_v30  ;;  %v461_v47 = vsel %vm333_vm8, %v269_v35, %v397_v42  ;;  %v400_v49 = vmul.f32 0.2, %v272_v43  ;;  %v462_v50 = vsel %vm334_vm9, %v270_v38, %v398_v46 }
  0x96   :  { %v1046_v51 = vunpack.c.h.bf16 %v1240_v30  ;;  %v1194_v54 = vpack.c.bf16 %v462_v50, %v461_v47  ;;  %v463_v55 = vsel %vm335_vm10, %v271_v39, %v399_v48 }
  0x97   :  { %v204_v52 = vmul.f32 %v1045_v40, %v1294_v1  ;;  %v464_v56 = vsel %vm336_vm11, %v272_v43, %v400_v49 }
  0x98   :  { %v1199_v58 = vpack.c.bf16 %v464_v56, %v463_v55  ;;  %v205_v59 = vmul.f32 %v1046_v51, %v1294_v1 }
  0x99   :  { %v273_v60 = vadd.f32 %v1308_v7, %v204_v52 }
  0x9a   :  { %v274_v63 = vadd.f32 %v1308_v7, %v205_v59 }
  0x9b   :  { %vm337_vm12 = vcmp.ge.f32.partialorder %v273_v60, 0.0  ;;  %v401_v0 = vmul.f32 0.2, %v273_v60 }
  0x9c   :  { %v1241_v44 = vld [vmem:[%s1619_s0 + $0xf8] sm:$0xff]   ;;  %vm338_vm13 = vcmp.ge.f32.partialorder %v274_v63, 0.0  ;;  %v402_v4 = vmul.f32 0.2, %v274_v63 }
  0x9d   :  { %1268 = vst [vmem:[%s1621_s2 + $0xd8] sm:$0xff] %v1189_v45   ;;  %v1049_v53 = vunpack.c.l.bf16 %v1241_v44  ;;  %v1050_v57 = vunpack.c.h.bf16 %v1241_v44  ;;  %1269 = vst [vmem:[%s1621_s2 + $0xe0] sm:$0xff] %v1194_v54   ;;  %v465_v5 = vsel %vm337_vm12, %v273_v60, %v401_v0 }
  0x9e   :  { %1270 = vst [vmem:[%s1621_s2 + $0xe8] sm:$0xff] %v1199_v58  }
  0x9f   :  { %v206_v61 = vmul.f32 %v1049_v53, %v1294_v1  ;;  %v207_v62 = vmul.f32 %v1050_v57, %v1294_v1  ;;  %v466_v1 = vsel %vm338_vm13, %v274_v63, %v402_v4 }
  0xa0   :  { %v1204_v9 = vpack.c.bf16 %v466_v1, %v465_v5 }
  0xa1   :  { %v275_v2 = vadd.f32 %v1308_v7, %v206_v61  ;;  %v276_v3 = vadd.f32 %v1308_v7, %v207_v62 }
  0xa2   :  { %1271 = vst [vmem:[%s1621_s2 + $0xf0] sm:$0xff] %v1204_v9  }
  0xa3   :  { %vm339_vm14 = vcmp.ge.f32.partialorder %v275_v2, 0.0  ;;  %vm340_vm15 = vcmp.ge.f32.partialorder %v276_v3, 0.0  ;;  %v403_v6 = vmul.f32 0.2, %v275_v2  ;;  %v404_v8 = vmul.f32 0.2, %v276_v3 }
  0xa5   :  { %v467_v10 = vsel %vm339_vm14, %v275_v2, %v403_v6  ;;  %v468_v11 = vsel %vm340_vm15, %v276_v3, %v404_v8 }
  0xa6   :  { %v1209_v12 = vpack.c.bf16 %v468_v11, %v467_v10 }
  0xa8   :  { %1272 = vst [vmem:[%s1621_s2 + $0xf8] sm:$0xff] %v1209_v12  }

// kernel: cnn_unit_pallas.2
= control target key start
LH: loop header
LB: loop body
LE: loop exit
PB: predicated region body
PF: predicated region fallthrough
CT: control target
= control target key end

     0   :  { %s2124_s1 = inlined_call_operand.vmem [shape: bf16[128,128], index: 1, kind: input, shape index: {}]   ;;  %s2125_s0 = inlined_call_operand.vmem [shape: bf16[512,128], index: 0, kind: input, shape index: {}]   ;;  %s2126_s2 = inlined_call_operand.vmem [shape: bf16[512,128], index: 2, kind: output, shape index: {0}]   ;;  %s2127_s3 = inlined_call_operand.vmem [shape: f32[1,2,128], index: 3, kind: output, shape index: {1}]  }
   0x1   :  { %v1650_v0 = vld [vmem:[%s2124_s1] sm:$0xff]   ;;  %v1651_v1 = vld [vmem:[%s2124_s1 + $0x8] sm:$0xff]   ;;  %v1652_v2 = vld [vmem:[%s2124_s1 + $0x10] sm:$0xff]  }
   0x2   :  { %1554 = vmatprep.subr.bf16.mxu0 %v1650_v0  ;;  %1634 = vmatprep.subr.bf16.mxu1 %v1650_v0  ;;  %v1653_v3 = vld [vmem:[%s2124_s1 + $0x18] sm:$0xff]   ;;  %v1658_v4 = vld [vmem:[%s2125_s0] sm:$0xff]   ;;  %v1655_v6 = vld [vmem:[%s2124_s1 + $0x28] sm:$0xff]  }
   0x3   :  { %1555 = vmatpush3.bf16.msra.mxu0 %v1650_v0  ;;  %1642 = vmatpush3.bf16.msra.mxu1 %v1650_v0  ;;  %v1654_v5 = vld [vmem:[%s2124_s1 + $0x20] sm:$0xff]   ;;  %v1656_v7 = vld [vmem:[%s2124_s1 + $0x30] sm:$0xff]   ;;  %v1657_v8 = vld [vmem:[%s2124_s1 + $0x38] sm:$0xff]  }
   0x4   :  { %1556 = vmatprep.subr.bf16.mxu0 %v1651_v1  ;;  %1635 = vmatprep.subr.bf16.mxu1 %v1651_v1  ;;  %v1674_v9 = vld [vmem:[%s2125_s0 + $0x80] sm:$0xff]   ;;  %v1659_v10 = vld [vmem:[%s2125_s0 + $0x8] sm:$0xff]   ;;  %v1660_v11 = vld [vmem:[%s2125_s0 + $0x10] sm:$0xff]  }
   0x5   :  { %1570 = vmatprep.mubr.bf16.mxu0 %v1658_v4  ;;  %1602 = vmatprep.mubr.bf16.mxu1 %v1674_v9  ;;  %v1675_v12 = vld [vmem:[%s2125_s0 + $0x88] sm:$0xff]   ;;  %v1676_v13 = vld [vmem:[%s2125_s0 + $0x90] sm:$0xff]   ;;  %v1661_v14 = vld [vmem:[%s2125_s0 + $0x18] sm:$0xff]  }
   0x6   :  { %v1662_v15 = vld [vmem:[%s2125_s0 + $0x20] sm:$0xff]   ;;  %v1677_v16 = vld [vmem:[%s2125_s0 + $0x98] sm:$0xff]   ;;  %v1663_v18 = vld [vmem:[%s2125_s0 + $0x28] sm:$0xff]  }
   0x7   :  { %1557 = vmatpush3.bf16.msra.mxu0 %v1651_v1  ;;  %1643 = vmatpush3.bf16.msra.mxu1 %v1651_v1  ;;  %v1678_v17 = vld [vmem:[%s2125_s0 + $0xa0] sm:$0xff]   ;;  %v1679_v19 = vld [vmem:[%s2125_s0 + $0xa8] sm:$0xff]   ;;  %v1664_v20 = vld [vmem:[%s2125_s0 + $0x30] sm:$0xff]  }
   0x8   :  { %1558 = vmatprep.subr.bf16.mxu0 %v1652_v2  ;;  %1636 = vmatprep.subr.bf16.mxu1 %v1652_v2  ;;  %v1680_v21 = vld [vmem:[%s2125_s0 + $0xb0] sm:$0xff]   ;;  %v1665_v22 = vld [vmem:[%s2125_s0 + $0x38] sm:$0xff]   ;;  %v1666_v24 = vld [vmem:[%s2125_s0 + $0x40] sm:$0xff]  }
   0x9   :  { %v1681_v23 = vld [vmem:[%s2125_s0 + $0xb8] sm:$0xff]   ;;  %v1682_v25 = vld [vmem:[%s2125_s0 + $0xc0] sm:$0xff]   ;;  %v1667_v26 = vld [vmem:[%s2125_s0 + $0x48] sm:$0xff]  }
   0xa   :  { %v1683_v27 = vld [vmem:[%s2125_s0 + $0xc8] sm:$0xff]   ;;  %v1668_v28 = vld [vmem:[%s2125_s0 + $0x50] sm:$0xff]   ;;  %v1669_v30 = vld [vmem:[%s2125_s0 + $0x58] sm:$0xff]  }
   0xb   :  { %1559 = vmatpush3.bf16.msra.mxu0 %v1652_v2  ;;  %1644 = vmatpush3.bf16.msra.mxu1 %v1652_v2  ;;  %v1684_v29 = vld [vmem:[%s2125_s0 + $0xd0] sm:$0xff]   ;;  %v1685_v31 = vld [vmem:[%s2125_s0 + $0xd8] sm:$0xff]   ;;  %v1670_v32 = vld [vmem:[%s2125_s0 + $0x60] sm:$0xff]  }
   0xc   :  { %1560 = vmatprep.subr.bf16.mxu0 %v1653_v3  ;;  %1637 = vmatprep.subr.bf16.mxu1 %v1653_v3  ;;  %v1686_v33 = vld [vmem:[%s2125_s0 + $0xe0] sm:$0xff]   ;;  %v1671_v34 = vld [vmem:[%s2125_s0 + $0x68] sm:$0xff]   ;;  %v1672_v36 = vld [vmem:[%s2125_s0 + $0x70] sm:$0xff]  }
   0xd   :  { %v1687_v35 = vld [vmem:[%s2125_s0 + $0xe8] sm:$0xff]   ;;  %v1688_v37 = vld [vmem:[%s2125_s0 + $0xf0] sm:$0xff]   ;;  %v1673_v38 = vld [vmem:[%s2125_s0 + $0x78] sm:$0xff]  }
   0xe   :  { %v1689_v39 = vld [vmem:[%s2125_s0 + $0xf8] sm:$0xff]  }
   0xf   :  { %1561 = vmatpush3.bf16.msra.mxu0 %v1653_v3  ;;  %1645 = vmatpush3.bf16.msra.mxu1 %v1653_v3 }
  0x10   :  { %1562 = vmatprep.subr.bf16.mxu0 %v1654_v5  ;;  %1638 = vmatprep.subr.bf16.mxu1 %v1654_v5 }
  0x13   :  { %1563 = vmatpush3.bf16.msra.mxu0 %v1654_v5  ;;  %1646 = vmatpush3.bf16.msra.mxu1 %v1654_v5 }
  0x14   :  { %1564 = vmatprep.subr.bf16.mxu0 %v1655_v6  ;;  %1639 = vmatprep.subr.bf16.mxu1 %v1655_v6 }
  0x17   :  { %1565 = vmatpush3.bf16.msra.mxu0 %v1655_v6  ;;  %1647 = vmatpush3.bf16.msra.mxu1 %v1655_v6 }
  0x18   :  { %1566 = vmatprep.subr.bf16.mxu0 %v1656_v7  ;;  %1640 = vmatprep.subr.bf16.mxu1 %v1656_v7 }
  0x1b   :  { %1567 = vmatpush3.bf16.msra.mxu0 %v1656_v7  ;;  %1648 = vmatpush3.bf16.msra.mxu1 %v1656_v7 }
  0x1c   :  { %1568 = vmatprep.subr.bf16.mxu0 %v1657_v8  ;;  %1641 = vmatprep.subr.bf16.mxu1 %v1657_v8 }
  0x1f   :  { %1569 = vmatpush3.bf16.msra.mxu0 %v1657_v8  ;;  %1649 = vmatpush3.bf16.msra.mxu1 %v1657_v8 }
  0x22   :  { %1571 = vmatmul.mubr.bf16.vlgmr.msra.gmra.mrb[0].mxu0 %v1659_v10  ;;  %1603 = vmatmul.mubr.bf16.vlgmr.msra.gmra.mrb[0].mxu1 %v1675_v12 }
  0x23   :  { %1574 = vmatprep.mubr.bf16.mxu0 %v1660_v11  ;;  %1606 = vmatprep.mubr.bf16.mxu1 %v1676_v13 }
  0x2a   :  { %1575 = vmatmul.mubr.bf16.gmra.mrb[4].mxu0 %v1661_v14  ;;  %1607 = vmatmul.mubr.bf16.gmra.mrb[4].mxu1 %v1677_v16 }
  0x2b   :  { %1578 = vmatprep.mubr.bf16.mxu0 %v1662_v15  ;;  %1610 = vmatprep.mubr.bf16.mxu1 %v1678_v17 }
  0x32   :  { %1579 = vmatmul.mubr.bf16.gmra.mrb[8].mxu0 %v1663_v18  ;;  %1611 = vmatmul.mubr.bf16.gmra.mrb[8].mxu1 %v1679_v19 }
  0x33   :  { %1582 = vmatprep.mubr.bf16.mxu0 %v1664_v20  ;;  %1614 = vmatprep.mubr.bf16.mxu1 %v1680_v21 }
  0x3a   :  { %1583 = vmatmul.mubr.bf16.gmra.mrb[12].mxu0 %v1665_v22  ;;  %1615 = vmatmul.mubr.bf16.gmra.mrb[12].mxu1 %v1681_v23 }
  0x3b   :  { %1586 = vmatprep.mubr.bf16.mxu0 %v1666_v24  ;;  %1618 = vmatprep.mubr.bf16.mxu1 %v1682_v25 }
  0x42   :  { %1587 = vmatmul.mubr.bf16.gmra.mrb[16].mxu0 %v1667_v26  ;;  %1619 = vmatmul.mubr.bf16.gmra.mrb[16].mxu1 %v1683_v27 }
  0x43   :  { %1590 = vmatprep.mubr.bf16.mxu0 %v1668_v28  ;;  %1622 = vmatprep.mubr.bf16.mxu1 %v1684_v29 }
  0x4a   :  { %1591 = vmatmul.mubr.bf16.gmra.mrb[20].mxu0 %v1669_v30  ;;  %1623 = vmatmul.mubr.bf16.gmra.mrb[20].mxu1 %v1685_v31 }
  0x4b   :  { %1594 = vmatprep.mubr.bf16.mxu0 %v1670_v32  ;;  %1626 = vmatprep.mubr.bf16.mxu1 %v1686_v33 }
  0x52   :  { %1595 = vmatmul.mubr.bf16.gmra.mrb[24].mxu0 %v1671_v34  ;;  %1627 = vmatmul.mubr.bf16.gmra.mrb[24].mxu1 %v1687_v35 }
  0x53   :  { %1598 = vmatprep.mubr.bf16.mxu0 %v1672_v36  ;;  %1630 = vmatprep.mubr.bf16.mxu1 %v1688_v37 }
  0x5a   :  { %1599 = vmatmul.mubr.bf16.gmra.mrb[28].mxu0 %v1673_v38  ;;  %1631 = vmatmul.mubr.bf16.gmra.mrb[28].mxu1 %v1689_v39 }
  0xf5   :  { %v1572_v40 = vpop.f32.mrb[0].mxu0  ;;  %v1830_v41 = vpop.f32.mrb[0].mxu1 }
  0xf6   :  { %v368_v42 = vpop.f32.mrb[1].mxu0  ;;  %v1832_v43 = vpop.f32.mrb[1].mxu1  ;;  %v1015_v55 = vmul.f32 %v1572_v40, %v1572_v40 }
  0xf7   :  { %v1573_v44 = vpop.f32.mrb[2].mxu0  ;;  %v1834_v45 = vpop.f32.mrb[2].mxu1  ;;  %v1013_v46 = vmul.f32 %v368_v42, %v368_v42 }
  0xf8   :  { %v1331_v47 = vpack.c.bf16 %v1573_v44, %v1572_v40  ;;  %v371_v48 = vpop.f32.mrb[3].mxu0  ;;  %v1411_v49 = vpack.c.bf16 %v1834_v45, %v1830_v41  ;;  %v1838_v50 = vpop.f32.mrb[3].mxu1  ;;  %v1016_v58 = vmul.f32 %v1573_v44, %v1573_v44 }
  0xf9   :  { %v1326_v51 = vpack.c.bf16 %v371_v48, %v368_v42  ;;  %v943_v52 = vadd.f32 %v371_v48, %v368_v42  ;;  %v1014_v53 = vmul.f32 %v371_v48, %v371_v48  ;;  %v1406_v54 = vpack.c.bf16 %v1838_v50, %v1832_v43 }
  0xfa   :  { %1483 = vst [vmem:[%s2126_s2 + $0x8] sm:$0xff] %v1331_v47   ;;  %1499 = vst [vmem:[%s2126_s2 + $0x88] sm:$0xff] %v1411_v49  }
  0xfb   :  { %1327 = vst [vmem:[%s2126_s2] sm:$0xff] %v1326_v51   ;;  %v944_v56 = vadd.f32 %v1572_v40, %v943_v52  ;;  %v1077_v57 = vadd.f32 %v1014_v53, %v1013_v46  ;;  %1498 = vst [vmem:[%s2126_s2 + $0x80] sm:$0xff] %v1406_v54  }
  0xfd   :  { %v1078_v59 = vadd.f32 %v1077_v57, %v1015_v55  ;;  %v1576_v60 = vpop.f32.mrb[4].mxu0  ;;  %v945_v61 = vadd.f32 %v1573_v44, %v944_v56  ;;  %v1854_v62 = vpop.f32.mrb[4].mxu1 }
  0xfe   :  { %v384_v63 = vpop.f32.mrb[5].mxu0  ;;  %v1856_v0 = vpop.f32.mrb[5].mxu1  ;;  %v1019_v15 = vmul.f32 %v1576_v60, %v1576_v60 }
  0xff   :  { %v946_v1 = vadd.f32 %v945_v61, %v384_v63  ;;  %v1017_v2 = vmul.f32 %v384_v63, %v384_v63  ;;  %v1079_v3 = vadd.f32 %v1078_v59, %v1016_v58  ;;  %v1577_v4 = vpop.f32.mrb[6].mxu0  ;;  %v1858_v5 = vpop.f32.mrb[6].mxu1 }
 0x100   :  { %v1341_v6 = vpack.c.bf16 %v1577_v4, %v1576_v60  ;;  %v387_v7 = vpop.f32.mrb[7].mxu0  ;;  %v1421_v8 = vpack.c.bf16 %v1858_v5, %v1854_v62  ;;  %v1862_v9 = vpop.f32.mrb[7].mxu1  ;;  %v1020_v18 = vmul.f32 %v1577_v4, %v1577_v4 }
 0x101   :  { %v1080_v10 = vadd.f32 %v1079_v3, %v1017_v2  ;;  %v1336_v11 = vpack.c.bf16 %v387_v7, %v384_v63  ;;  %v947_v12 = vadd.f32 %v946_v1, %v387_v7  ;;  %v1018_v13 = vmul.f32 %v387_v7, %v387_v7 }
 0x102   :  { %1485 = vst [vmem:[%s2126_s2 + $0x18] sm:$0xff] %v1341_v6   ;;  %1501 = vst [vmem:[%s2126_s2 + $0x98] sm:$0xff] %v1421_v8   ;;  %v1416_v14 = vpack.c.bf16 %v1862_v9, %v1856_v0 }
 0x103   :  { %1484 = vst [vmem:[%s2126_s2 + $0x10] sm:$0xff] %v1336_v11   ;;  %v948_v16 = vadd.f32 %v1576_v60, %v947_v12  ;;  %v1081_v17 = vadd.f32 %v1080_v10, %v1018_v13 }
 0x104   :  { %1500 = vst [vmem:[%s2126_s2 + $0x90] sm:$0xff] %v1416_v14  }
 0x105   :  { %v1082_v19 = vadd.f32 %v1081_v17, %v1019_v15  ;;  %v1580_v20 = vpop.f32.mrb[8].mxu0  ;;  %v949_v21 = vadd.f32 %v1577_v4, %v948_v16  ;;  %v1878_v22 = vpop.f32.mrb[8].mxu1 }
 0x106   :  { %v400_v23 = vpop.f32.mrb[9].mxu0  ;;  %v1880_v24 = vpop.f32.mrb[9].mxu1  ;;  %v1023_v39 = vmul.f32 %v1580_v20, %v1580_v20 }
 0x107   :  { %v950_v25 = vadd.f32 %v949_v21, %v400_v23  ;;  %v1021_v26 = vmul.f32 %v400_v23, %v400_v23  ;;  %v1083_v27 = vadd.f32 %v1082_v19, %v1020_v18  ;;  %v1581_v28 = vpop.f32.mrb[10].mxu0  ;;  %v1882_v29 = vpop.f32.mrb[10].mxu1 }
 0x108   :  { %v1351_v30 = vpack.c.bf16 %v1581_v28, %v1580_v20  ;;  %v403_v31 = vpop.f32.mrb[11].mxu0  ;;  %v1431_v32 = vpack.c.bf16 %v1882_v29, %v1878_v22  ;;  %v1886_v33 = vpop.f32.mrb[11].mxu1  ;;  %v1024_v44 = vmul.f32 %v1581_v28, %v1581_v28 }
 0x109   :  { %v1084_v34 = vadd.f32 %v1083_v27, %v1021_v26  ;;  %v1346_v35 = vpack.c.bf16 %v403_v31, %v400_v23  ;;  %v951_v36 = vadd.f32 %v950_v25, %v403_v31  ;;  %v1022_v37 = vmul.f32 %v403_v31, %v403_v31 }
 0x10a   :  { %1487 = vst [vmem:[%s2126_s2 + $0x28] sm:$0xff] %v1351_v30   ;;  %1503 = vst [vmem:[%s2126_s2 + $0xa8] sm:$0xff] %v1431_v32   ;;  %v1426_v38 = vpack.c.bf16 %v1886_v33, %v1880_v24 }
 0x10b   :  { %1486 = vst [vmem:[%s2126_s2 + $0x20] sm:$0xff] %v1346_v35   ;;  %v952_v40 = vadd.f32 %v1580_v20, %v951_v36  ;;  %v1085_v42 = vadd.f32 %v1084_v34, %v1022_v37 }
 0x10c   :  { %1502 = vst [vmem:[%s2126_s2 + $0xa0] sm:$0xff] %v1426_v38  }
 0x10d   :  { %v1086_v46 = vadd.f32 %v1085_v42, %v1023_v39  ;;  %v1584_v47 = vpop.f32.mrb[12].mxu0  ;;  %v953_v48 = vadd.f32 %v1581_v28, %v952_v40  ;;  %v1902_v49 = vpop.f32.mrb[12].mxu1 }
 0x10e   :  { %v416_v51 = vpop.f32.mrb[13].mxu0  ;;  %v1904_v52 = vpop.f32.mrb[13].mxu1  ;;  %v1027_v6 = vmul.f32 %v1584_v47, %v1584_v47 }
 0x10f   :  { %v954_v53 = vadd.f32 %v953_v48, %v416_v51  ;;  %v1025_v54 = vmul.f32 %v416_v51, %v416_v51  ;;  %v1087_v55 = vadd.f32 %v1086_v46, %v1024_v44  ;;  %v1585_v56 = vpop.f32.mrb[14].mxu0  ;;  %v1906_v57 = vpop.f32.mrb[14].mxu1 }
 0x110   :  { %v1361_v58 = vpack.c.bf16 %v1585_v56, %v1584_v47  ;;  %v419_v59 = vpop.f32.mrb[15].mxu0  ;;  %v1441_v60 = vpack.c.bf16 %v1906_v57, %v1902_v49  ;;  %v1910_v61 = vpop.f32.mrb[15].mxu1  ;;  %v1028_v10 = vmul.f32 %v1585_v56, %v1585_v56 }
 0x111   :  { %v1088_v63 = vadd.f32 %v1087_v55, %v1025_v54  ;;  %v1356_v1 = vpack.c.bf16 %v419_v59, %v416_v51  ;;  %v955_v2 = vadd.f32 %v954_v53, %v419_v59  ;;  %v1026_v3 = vmul.f32 %v419_v59, %v419_v59 }
 0x112   :  { %1489 = vst [vmem:[%s2126_s2 + $0x38] sm:$0xff] %v1361_v58   ;;  %1505 = vst [vmem:[%s2126_s2 + $0xb8] sm:$0xff] %v1441_v60   ;;  %v1436_v4 = vpack.c.bf16 %v1910_v61, %v1904_v52 }
 0x113   :  { %1488 = vst [vmem:[%s2126_s2 + $0x30] sm:$0xff] %v1356_v1   ;;  %v956_v7 = vadd.f32 %v1584_v47, %v955_v2  ;;  %v1089_v8 = vadd.f32 %v1088_v63, %v1026_v3 }
 0x114   :  { %1504 = vst [vmem:[%s2126_s2 + $0xb0] sm:$0xff] %v1436_v4  }
 0x115   :  { %v1090_v11 = vadd.f32 %v1089_v8, %v1027_v6  ;;  %v1588_v12 = vpop.f32.mrb[16].mxu0  ;;  %v957_v13 = vadd.f32 %v1585_v56, %v956_v7  ;;  %v1926_v14 = vpop.f32.mrb[16].mxu1 }
 0x116   :  { %v432_v15 = vpop.f32.mrb[17].mxu0  ;;  %v1928_v16 = vpop.f32.mrb[17].mxu1  ;;  %v1031_v35 = vmul.f32 %v1588_v12, %v1588_v12 }
 0x117   :  { %v958_v17 = vadd.f32 %v957_v13, %v432_v15  ;;  %v1029_v18 = vmul.f32 %v432_v15, %v432_v15  ;;  %v1091_v19 = vadd.f32 %v1090_v11, %v1028_v10  ;;  %v1589_v20 = vpop.f32.mrb[18].mxu0  ;;  %v1930_v21 = vpop.f32.mrb[18].mxu1 }
 0x118   :  { %v1371_v23 = vpack.c.bf16 %v1589_v20, %v1588_v12  ;;  %v435_v25 = vpop.f32.mrb[19].mxu0  ;;  %v1451_v26 = vpack.c.bf16 %v1930_v21, %v1926_v14  ;;  %v1934_v27 = vpop.f32.mrb[19].mxu1  ;;  %v1032_v38 = vmul.f32 %v1589_v20, %v1589_v20 }
 0x119   :  { %v1092_v28 = vadd.f32 %v1091_v19, %v1029_v18  ;;  %v1366_v30 = vpack.c.bf16 %v435_v25, %v432_v15  ;;  %v959_v31 = vadd.f32 %v958_v17, %v435_v25  ;;  %v1030_v32 = vmul.f32 %v435_v25, %v435_v25 }
 0x11a   :  { %1491 = vst [vmem:[%s2126_s2 + $0x48] sm:$0xff] %v1371_v23   ;;  %1507 = vst [vmem:[%s2126_s2 + $0xc8] sm:$0xff] %v1451_v26   ;;  %v1446_v34 = vpack.c.bf16 %v1934_v27, %v1928_v16 }
 0x11b   :  { %1490 = vst [vmem:[%s2126_s2 + $0x40] sm:$0xff] %v1366_v30   ;;  %v960_v36 = vadd.f32 %v1588_v12, %v959_v31  ;;  %v1093_v37 = vadd.f32 %v1092_v28, %v1030_v32 }
 0x11c   :  { %1506 = vst [vmem:[%s2126_s2 + $0xc0] sm:$0xff] %v1446_v34  }
 0x11d   :  { %v1094_v39 = vadd.f32 %v1093_v37, %v1031_v35  ;;  %v1592_v40 = vpop.f32.mrb[20].mxu0  ;;  %v961_v42 = vadd.f32 %v1589_v20, %v960_v36  ;;  %v1950_v44 = vpop.f32.mrb[20].mxu1 }
 0x11e   :  { %v448_v46 = vpop.f32.mrb[21].mxu0  ;;  %v1952_v47 = vpop.f32.mrb[21].mxu1  ;;  %v1035_v6 = vmul.f32 %v1592_v40, %v1592_v40 }
 0x11f   :  { %v962_v48 = vadd.f32 %v961_v42, %v448_v46  ;;  %v1033_v51 = vmul.f32 %v448_v46, %v448_v46  ;;  %v1095_v53 = vadd.f32 %v1094_v39, %v1032_v38  ;;  %v1593_v54 = vpop.f32.mrb[22].mxu0  ;;  %v1954_v55 = vpop.f32.mrb[22].mxu1 }
 0x120   :  { %v1381_v56 = vpack.c.bf16 %v1593_v54, %v1592_v40  ;;  %v451_v58 = vpop.f32.mrb[23].mxu0  ;;  %v1461_v59 = vpack.c.bf16 %v1954_v55, %v1950_v44  ;;  %v1958_v60 = vpop.f32.mrb[23].mxu1  ;;  %v1036_v10 = vmul.f32 %v1593_v54, %v1593_v54 }
 0x121   :  { %v1096_v63 = vadd.f32 %v1095_v53, %v1033_v51  ;;  %v1376_v1 = vpack.c.bf16 %v451_v58, %v448_v46  ;;  %v963_v2 = vadd.f32 %v962_v48, %v451_v58  ;;  %v1034_v3 = vmul.f32 %v451_v58, %v451_v58 }
 0x122   :  { %1493 = vst [vmem:[%s2126_s2 + $0x58] sm:$0xff] %v1381_v56   ;;  %1509 = vst [vmem:[%s2126_s2 + $0xd8] sm:$0xff] %v1461_v59   ;;  %v1456_v4 = vpack.c.bf16 %v1958_v60, %v1952_v47 }
 0x123   :  { %1492 = vst [vmem:[%s2126_s2 + $0x50] sm:$0xff] %v1376_v1   ;;  %v964_v7 = vadd.f32 %v1592_v40, %v963_v2  ;;  %v1097_v8 = vadd.f32 %v1096_v63, %v1034_v3 }
 0x124   :  { %1508 = vst [vmem:[%s2126_s2 + $0xd0] sm:$0xff] %v1456_v4  }
 0x125   :  { %v1098_v11 = vadd.f32 %v1097_v8, %v1035_v6  ;;  %v1596_v12 = vpop.f32.mrb[24].mxu0  ;;  %v965_v13 = vadd.f32 %v1593_v54, %v964_v7  ;;  %v1974_v15 = vpop.f32.mrb[24].mxu1 }
 0x126   :  { %v464_v17 = vpop.f32.mrb[25].mxu0  ;;  %v1976_v18 = vpop.f32.mrb[25].mxu1  ;;  %v1039_v39 = vmul.f32 %v1596_v12, %v1596_v12 }
 0x127   :  { %v966_v19 = vadd.f32 %v965_v13, %v464_v17  ;;  %v1037_v20 = vmul.f32 %v464_v17, %v464_v17  ;;  %v1099_v23 = vadd.f32 %v1098_v11, %v1036_v10  ;;  %v1597_v25 = vpop.f32.mrb[26].mxu0  ;;  %v1978_v26 = vpop.f32.mrb[26].mxu1 }
 0x128   :  { %v1391_v28 = vpack.c.bf16 %v1597_v25, %v1596_v12  ;;  %v467_v30 = vpop.f32.mrb[27].mxu0  ;;  %v1471_v31 = vpack.c.bf16 %v1978_v26, %v1974_v15  ;;  %v1982_v32 = vpop.f32.mrb[27].mxu1  ;;  %v1040_v46 = vmul.f32 %v1597_v25, %v1597_v25 }
 0x129   :  { %v1100_v34 = vadd.f32 %v1099_v23, %v1037_v20  ;;  %v1386_v35 = vpack.c.bf16 %v467_v30, %v464_v17  ;;  %v967_v36 = vadd.f32 %v966_v19, %v467_v30  ;;  %v1038_v37 = vmul.f32 %v467_v30, %v467_v30 }
 0x12a   :  { %1495 = vst [vmem:[%s2126_s2 + $0x68] sm:$0xff] %v1391_v28   ;;  %1511 = vst [vmem:[%s2126_s2 + $0xe8] sm:$0xff] %v1471_v31   ;;  %v1466_v38 = vpack.c.bf16 %v1982_v32, %v1976_v18  ;;  %v1045_v31 = vmul.f32 %v1832_v43, %v1832_v43 }
 0x12b   :  { %1494 = vst [vmem:[%s2126_s2 + $0x60] sm:$0xff] %v1386_v35   ;;  %v968_v40 = vadd.f32 %v1596_v12, %v967_v36  ;;  %v1101_v42 = vadd.f32 %v1100_v34, %v1038_v37 }
 0x12c   :  { %1510 = vst [vmem:[%s2126_s2 + $0xe0] sm:$0xff] %v1466_v38   ;;  %v1046_v38 = vmul.f32 %v1838_v50, %v1838_v50 }
 0x12d   :  { %v1102_v48 = vadd.f32 %v1101_v42, %v1039_v39  ;;  %v1600_v51 = vpop.f32.mrb[28].mxu0  ;;  %v969_v53 = vadd.f32 %v1597_v25, %v968_v40  ;;  %v1998_v54 = vpop.f32.mrb[28].mxu1  ;;  %v1047_v39 = vmul.f32 %v1830_v41, %v1830_v41 }
 0x12e   :  { %v480_v56 = vpop.f32.mrb[29].mxu0  ;;  %v2000_v58 = vpop.f32.mrb[29].mxu1  ;;  %v1043_v19 = vmul.f32 %v1600_v51, %v1600_v51 }
 0x12f   :  { %v970_v59 = vadd.f32 %v969_v53, %v480_v56  ;;  %v1041_v63 = vmul.f32 %v480_v56, %v480_v56  ;;  %v1103_v1 = vadd.f32 %v1102_v48, %v1040_v46  ;;  %v1601_v2 = vpop.f32.mrb[30].mxu0  ;;  %v2002_v3 = vpop.f32.mrb[30].mxu1  ;;  %v1048_v46 = vmul.f32 %v1834_v45, %v1834_v45 }
 0x130   :  { %v1401_v4 = vpack.c.bf16 %v1601_v2, %v1600_v51  ;;  %v483_v6 = vpop.f32.mrb[31].mxu0  ;;  %v1481_v7 = vpack.c.bf16 %v2002_v3, %v1998_v54  ;;  %v2006_v8 = vpop.f32.mrb[31].mxu1  ;;  %v1044_v25 = vmul.f32 %v1601_v2, %v1601_v2 }
 0x131   :  { %v1104_v10 = vadd.f32 %v1103_v1, %v1041_v63  ;;  %v1396_v11 = vpack.c.bf16 %v483_v6, %v480_v56  ;;  %v971_v12 = vadd.f32 %v970_v59, %v483_v6  ;;  %v1042_v13 = vmul.f32 %v483_v6, %v483_v6 }
 0x132   :  { %1497 = vst [vmem:[%s2126_s2 + $0x78] sm:$0xff] %v1401_v4   ;;  %1513 = vst [vmem:[%s2126_s2 + $0xf8] sm:$0xff] %v1481_v7   ;;  %v1476_v17 = vpack.c.bf16 %v2006_v8, %v2000_v58  ;;  %v1050_v63 = vmul.f32 %v1862_v9, %v1862_v9 }
 0x133   :  { %1496 = vst [vmem:[%s2126_s2 + $0x70] sm:$0xff] %v1396_v11   ;;  %v972_v20 = vadd.f32 %v1600_v51, %v971_v12  ;;  %v1105_v23 = vadd.f32 %v1104_v10, %v1042_v13  ;;  %v1054_v12 = vmul.f32 %v1886_v33, %v1886_v33 }
 0x134   :  { %1512 = vst [vmem:[%s2126_s2 + $0xf0] sm:$0xff] %v1476_v17  }
 0x135   :  { %v1106_v28 = vadd.f32 %v1105_v23, %v1043_v19  ;;  %v973_v30 = vadd.f32 %v1601_v2, %v972_v20 }
 0x137   :  { %v974_v34 = vadd.f32 %v973_v30, %v1832_v43  ;;  %v1107_v35 = vadd.f32 %v1106_v28, %v1044_v25  ;;  %v1049_v43 = vmul.f32 %v1856_v0, %v1856_v0  ;;  %v1058_v30 = vmul.f32 %v1910_v61, %v1910_v61 }
 0x139   :  { %v1108_v36 = vadd.f32 %v1107_v35, %v1045_v31  ;;  %v975_v37 = vadd.f32 %v974_v34, %v1838_v50 }
 0x13b   :  { %v976_v40 = vadd.f32 %v1830_v41, %v975_v37  ;;  %v1109_v42 = vadd.f32 %v1108_v36, %v1046_v38  ;;  %v1051_v41 = vmul.f32 %v1854_v62, %v1854_v62 }
 0x13d   :  { %v1110_v48 = vadd.f32 %v1109_v42, %v1047_v39  ;;  %v977_v51 = vadd.f32 %v1834_v45, %v976_v40  ;;  %v1052_v45 = vmul.f32 %v1858_v5, %v1858_v5  ;;  %v1062_v40 = vmul.f32 %v1934_v27, %v1934_v27 }
 0x13f   :  { %v978_v53 = vadd.f32 %v977_v51, %v1856_v0  ;;  %v1111_v56 = vadd.f32 %v1110_v48, %v1048_v46  ;;  %v1053_v0 = vmul.f32 %v1880_v24, %v1880_v24 }
 0x141   :  { %v1112_v59 = vadd.f32 %v1111_v56, %v1049_v43  ;;  %v979_v50 = vadd.f32 %v978_v53, %v1862_v9 }
 0x143   :  { %v980_v1 = vadd.f32 %v1854_v62, %v979_v50  ;;  %v1113_v2 = vadd.f32 %v1112_v59, %v1050_v63  ;;  %v1055_v62 = vmul.f32 %v1878_v22, %v1878_v22  ;;  %v1066_v59 = vmul.f32 %v1958_v60, %v1958_v60 }
 0x145   :  { %v1114_v4 = vadd.f32 %v1113_v2, %v1051_v41  ;;  %v981_v6 = vadd.f32 %v1858_v5, %v980_v1  ;;  %v1056_v5 = vmul.f32 %v1882_v29, %v1882_v29 }
 0x147   :  { %v982_v7 = vadd.f32 %v981_v6, %v1880_v24  ;;  %v1115_v10 = vadd.f32 %v1114_v4, %v1052_v45  ;;  %v1057_v24 = vmul.f32 %v1904_v52, %v1904_v52  ;;  %v1070_v6 = vmul.f32 %v1982_v32, %v1982_v32 }
 0x149   :  { %v1116_v11 = vadd.f32 %v1115_v10, %v1053_v0  ;;  %v983_v9 = vadd.f32 %v982_v7, %v1886_v33 }
 0x14b   :  { %v984_v13 = vadd.f32 %v1878_v22, %v983_v9  ;;  %v1117_v17 = vadd.f32 %v1116_v11, %v1054_v12  ;;  %v1059_v22 = vmul.f32 %v1902_v49, %v1902_v49 }
 0x14d   :  { %v1118_v19 = vadd.f32 %v1117_v17, %v1055_v62  ;;  %v985_v20 = vadd.f32 %v1882_v29, %v984_v13  ;;  %v1060_v29 = vmul.f32 %v1906_v57, %v1906_v57  ;;  %v1074_v13 = vmul.f32 %v2006_v8, %v2006_v8 }
 0x14f   :  { %v986_v23 = vadd.f32 %v985_v20, %v1904_v52  ;;  %v1119_v25 = vadd.f32 %v1118_v19, %v1056_v5  ;;  %v1061_v52 = vmul.f32 %v1928_v16, %v1928_v16 }
 0x151   :  { %v1120_v28 = vadd.f32 %v1119_v25, %v1057_v24  ;;  %v987_v33 = vadd.f32 %v986_v23, %v1910_v61 }
 0x153   :  { %v988_v31 = vadd.f32 %v1902_v49, %v987_v33  ;;  %v1121_v34 = vadd.f32 %v1120_v28, %v1058_v30  ;;  %v1063_v49 = vmul.f32 %v1926_v14, %v1926_v14 }
 0x155   :  { %v1122_v35 = vadd.f32 %v1121_v34, %v1059_v22  ;;  %v989_v36 = vadd.f32 %v1906_v57, %v988_v31  ;;  %v1064_v57 = vmul.f32 %v1930_v21, %v1930_v21 }
 0x157   :  { %v990_v37 = vadd.f32 %v989_v36, %v1928_v16  ;;  %v1123_v38 = vadd.f32 %v1122_v35, %v1060_v29  ;;  %v1065_v16 = vmul.f32 %v1952_v47, %v1952_v47 }
 0x159   :  { %v1124_v39 = vadd.f32 %v1123_v38, %v1061_v52  ;;  %v991_v61 = vadd.f32 %v990_v37, %v1934_v27 }
 0x15b   :  { %v992_v42 = vadd.f32 %v1926_v14, %v991_v61  ;;  %v1125_v46 = vadd.f32 %v1124_v39, %v1062_v40  ;;  %v1067_v14 = vmul.f32 %v1950_v44, %v1950_v44 }
 0x15d   :  { %v1126_v48 = vadd.f32 %v1125_v46, %v1063_v49  ;;  %v993_v51 = vadd.f32 %v1930_v21, %v992_v42  ;;  %v1068_v21 = vmul.f32 %v1954_v55, %v1954_v55 }
 0x15f   :  { %v994_v43 = vadd.f32 %v993_v51, %v1952_v47  ;;  %v1127_v53 = vadd.f32 %v1126_v48, %v1064_v57  ;;  %v1069_v47 = vmul.f32 %v1976_v18, %v1976_v18 }
 0x161   :  { %v1128_v56 = vadd.f32 %v1127_v53, %v1065_v16  ;;  %v995_v27 = vadd.f32 %v994_v43, %v1958_v60 }
 0x163   :  { %v996_v50 = vadd.f32 %v1950_v44, %v995_v27  ;;  %v1129_v63 = vadd.f32 %v1128_v56, %v1066_v59  ;;  %v1071_v44 = vmul.f32 %v1974_v15, %v1974_v15 }
 0x165   :  { %v1130_v41 = vadd.f32 %v1129_v63, %v1067_v14  ;;  %v997_v1 = vadd.f32 %v1954_v55, %v996_v50  ;;  %v1072_v55 = vmul.f32 %v1978_v26, %v1978_v26 }
 0x167   :  { %v998_v2 = vadd.f32 %v997_v1, %v1976_v18  ;;  %v1131_v45 = vadd.f32 %v1130_v41, %v1068_v21  ;;  %v1073_v18 = vmul.f32 %v2000_v58, %v2000_v58 }
 0x169   :  { %v1132_v4 = vadd.f32 %v1131_v45, %v1069_v47  ;;  %v999_v60 = vadd.f32 %v998_v2, %v1982_v32 }
 0x16b   :  { %v1000_v0 = vadd.f32 %v1974_v15, %v999_v60  ;;  %v1133_v7 = vadd.f32 %v1132_v4, %v1070_v6  ;;  %v1075_v15 = vmul.f32 %v1998_v54, %v1998_v54 }
 0x16d   :  { %v1134_v10 = vadd.f32 %v1133_v7, %v1071_v44  ;;  %v1001_v11 = vadd.f32 %v1978_v26, %v1000_v0  ;;  %v1076_v26 = vmul.f32 %v2002_v3, %v2002_v3 }
 0x16f   :  { %v1002_v9 = vadd.f32 %v1001_v11, %v2000_v58  ;;  %v1135_v12 = vadd.f32 %v1134_v10, %v1072_v55 }
 0x171   :  { %v1136_v62 = vadd.f32 %v1135_v12, %v1073_v18  ;;  %v1003_v32 = vadd.f32 %v1002_v9, %v2006_v8 }
 0x173   :  { %v1004_v17 = vadd.f32 %v1998_v54, %v1003_v32  ;;  %v1137_v5 = vadd.f32 %v1136_v62, %v1074_v13 }
 0x175   :  { %v1005_v19 = vadd.f32 %v2002_v3, %v1004_v17  ;;  %v1138_v20 = vadd.f32 %v1137_v5, %v1075_v15 }
 0x177   :  { %v1006_v58 = vrot.slane %v1005_v19, 4  ;;  %v1139_v24 = vadd.f32 %v1138_v20, %v1076_v26 }
 0x179   :  { %v1007_v23 = vadd.f32 %v1006_v58, %v1005_v19  ;;  %v1140_v25 = vrot.slane %v1139_v24, 4 }
 0x17b   :  { %v1008_v28 = vrot.slane %v1007_v23, 2  ;;  %v1141_v33 = vadd.f32 %v1140_v25, %v1139_v24 }
 0x17d   :  { %v1009_v30 = vadd.f32 %v1008_v28, %v1007_v23  ;;  %v1142_v8 = vrot.slane %v1141_v33, 2 }
 0x17f   :  { %v1010_v22 = vrot.slane %v1009_v30, 1  ;;  %v1143_v31 = vadd.f32 %v1142_v8, %v1141_v33 }
 0x181   :  { %v1011_v34 = vadd.f32 %v1010_v22, %v1009_v30  ;;  %v1144_v29 = vrot.slane %v1143_v31, 1 }
 0x183   :  { %1012 = vst [vmem:[%s2127_s3] sm:$0x1] %v1011_v34  ;;  %v1145_v54 = vadd.f32 %v1144_v29, %v1143_v31 }
 0x185   :  { %1146 = vst [vmem:[%s2127_s3 + $0x1] sm:$0x1] %v1145_v54 }

</bundles_post_ra>
